<compile_context>
chip_gen: v7x
topology: tpu7x:2x2x1
jax: 0.10.0
libtpu: 0.0.40
codegen_flags: <defaults>
</compile_context>

<pallas_src>
import numpy as np
import jax
import jax.numpy as jnp
from jax.experimental import pallas as pl
from jax.experimental.pallas import tpu as pltpu

H = 32                       # h_size
X = 16                       # x_size
NUM_LEAVES = 8
NUM_NODES = 2 * NUM_LEAVES - 1   # 15
LEVEL_SIZES = (4, 2, 1)          # internal-level widths (perfect binary tree)
NPAD = 8 * H                     # 256: padded fused-gate output width (4H = 128)


# ----------------------------- fused Pallas kernel --------------------------

def fused_tree_lstm_kernel(emb_ref, mask_ref, c0_ref, WiouT_ref, biou_ref,
                           UpadT_ref, bpad_ref, linWT_ref, linb_ref, out_ref):
    """TB trees per grid step, node-major rows; only logits leave the kernel."""
    TB = emb_ref.shape[0] // NUM_LEAVES

    # ---- leaves: iou = (W_iou(x_leaf) * mask_leaf) + b_iou -----------------
    iou = (jnp.dot(emb_ref[...], WiouT_ref[...],
                   preferred_element_type=jnp.float32) * mask_ref[...]
           + biou_ref[...])                                      # (TB*8, 3H)
    i = jax.nn.sigmoid(iou[:, :H])
    o = jax.nn.sigmoid(iou[:, H:2 * H])
    u = jnp.tanh(iou[:, 2 * H:3 * H])
    c = i * u + c0_ref[...]                                      # (TB*8, H)
    h = o * jnp.tanh(c)
    h_levels = [h]

    # ---- internal levels ---------------------------------------------------
    # Node-major layout: child-0 rows of a level are exactly the first n*TB
    # rows of the previous level, child-1 rows the next n*TB rows, so each
    # level needs only sublane-aligned static slices (no gathers / reshapes).
    for n in LEVEL_SIZES:                                        # 4, 2, 1
        half = n * TB
        h_c0, h_c1 = h[:half], h[half:]
        c_c0, c_c1 = c[:half], c[half:]
        hcat = jnp.concatenate([h_c0, h_c1], axis=1)             # (n*TB, 2H)
        # one fused matmul; output lanes [0,3H) = iou, [4H,6H) = f (vreg-aligned)
        fio = jnp.dot(hcat, UpadT_ref[...],
                      preferred_element_type=jnp.float32) + bpad_ref[...]
        i = jax.nn.sigmoid(fio[:, :H])
        o = jax.nn.sigmoid(fio[:, H:2 * H])
        u = jnp.tanh(fio[:, 2 * H:3 * H])
        f0 = jax.nn.sigmoid(fio[:, 4 * H:5 * H])
        f1 = jax.nn.sigmoid(fio[:, 5 * H:6 * H])
        c = i * u + (f0 * c_c0 + f1 * c_c1)                      # (n*TB, H)
        h = o * jnp.tanh(c)
        h_levels.append(h)

    # ---- logits = linear(dropout(h))  (dropout = identity, eval mode) ------
    h_all = jnp.concatenate(h_levels, axis=0)                    # (TB*15, H)
    out_ref[...] = (jnp.dot(h_all, linWT_ref[...],
                            preferred_element_type=jnp.float32) + linb_ref[...])


# ----------------------------- wrapper ---------------------------------------

def tree_lstm_forward(embedding, mask, h0, c0, params, trees_per_step=None):
    """embedding: (B, NUM_NODES, X); mask: (B, NUM_NODES); h0/c0: (B, NUM_NODES, H).

    h0 is never read: every node's h is produced inside the kernel before the
    final linear.  mask is applied to the leaf-row W_iou output (internal-node
    iou is overwritten by reduce_func in the original module, so its mask
    value is irrelevant).
    """
    (W_iouT, U_iouT, b_iou, U_fT, b_f, linWT, lin_b) = params
    del h0
    B = embedding.shape[0]

    if trees_per_step is None:
        # v7x: keep >= 2 grid steps so both TensorCores are fed.
        # v5e / v6e: pass trees_per_step=B (grid=(1,)) for minimum overhead.
        trees_per_step = B // 2 if (B % 2 == 0 and (B // 2) % 8 == 0) else B
    TB = trees_per_step
    assert B % TB == 0, "batch must be divisible by trees_per_step"
    assert TB % 8 == 0, "trees_per_step must be a multiple of 8 (sublane tile)"
    steps = B // TB

    # Fused, vreg-aligned gate weights: lanes [0,3H) = U_iou, [4H,6H) = U_f.
    U_padT = jnp.zeros((2 * H, NPAD), jnp.float32)
    U_padT = U_padT.at[:, :3 * H].set(U_iouT).at[:, 4 * H:6 * H].set(U_fT)
    b_pad = jnp.zeros((1, NPAD), jnp.float32)
    b_pad = b_pad.at[:, :3 * H].set(b_iou).at[:, 4 * H:6 * H].set(b_f)

    # Leaf rows only (no dead DMA), node-major within each grid step:
    #   row = (step*NUM_LEAVES + leaf) * TB + tree
    def to_node_major(x3, n_nodes):
        feat = x3.shape[-1]
        return (x3[:, :n_nodes, :]
                .reshape(steps, TB, n_nodes, feat)
                .transpose(0, 2, 1, 3)
                .reshape(steps * n_nodes * TB, feat))

    emb_nm = to_node_major(embedding.astype(jnp.float32), NUM_LEAVES)
    c0_nm = to_node_major(c0.astype(jnp.float32), NUM_LEAVES)
    mask_nm = to_node_major(mask.astype(jnp.float32)[..., None], NUM_LEAVES)

    leaf_rows = NUM_LEAVES * TB
    node_rows = NUM_NODES * TB

    def data_spec(rows, feat):
        return pl.BlockSpec((rows, feat), lambda g: (g, 0))

    def w_spec(r, c):
        return pl.BlockSpec((r, c), lambda g: (0, 0))

    out2d = pl.pallas_call(
        fused_tree_lstm_kernel,
        grid=(steps,),
        in_specs=[
            data_spec(leaf_rows, X),        # leaf embeddings (node-major)
            data_spec(leaf_rows, 1),        # leaf mask
            data_spec(leaf_rows, H),        # leaf c0
            w_spec(X, 3 * H),               # W_iou^T
            w_spec(1, 3 * H),               # b_iou
            w_spec(2 * H, NPAD),            # padded [U_iou | 0 | U_f | 0]^T
            w_spec(1, NPAD),                # padded [b_iou | 0 | b_f | 0]
            w_spec(H, H),                   # linear W^T
            w_spec(1, H),                   # linear b
        ],
        out_specs=pl.BlockSpec((node_rows, H), lambda g: (g, 0)),
        out_shape=jax.ShapeDtypeStruct((steps * node_rows, H), jnp.float32),
        compiler_params=pltpu.CompilerParams(
            dimension_semantics=("parallel",)),   # shards grid steps across TCs
    )(emb_nm, mask_nm, c0_nm, W_iouT, b_iou, U_padT, b_pad, linWT, lin_b)

    # Restore (B, NUM_NODES, H) ordering (layout plumbing only).
    return (out2d.reshape(steps, NUM_NODES, TB, H)
                 .transpose(0, 2, 1, 3)
                 .reshape(B, NUM_NODES, H))


# ----------------------------- NumPy float64 reference -----------------------

def _sigmoid(x):
    return 1.0 / (1.0 + np.exp(-x))


def reference_forward_np(embedding, mask, h0, c0, params):
    (W_iouT, U_iouT, b_iou, U_fT, b_f, linWT, lin_b) = [
        np.asarray(p, np.float64) for p in params]
    emb = np.asarray(embedding, np.float64)
    msk = np.asarray(mask, np.float64)
    c = np.asarray(c0, np.float64).copy()
    h = np.asarray(h0, np.float64).copy()

    iou_data = np.einsum('bnx,xo->bno', emb, W_iouT) * msk[..., None]

    # leaves
    li = list(range(NUM_LEAVES))
    iou = iou_data[:, li] + b_iou
    i, o, u = np.split(iou, 3, axis=-1)
    i, o, u = _sigmoid(i), _sigmoid(o), np.tanh(u)
    c[:, li] = i * u + c[:, li]
    h[:, li] = o * np.tanh(c[:, li])

    levels = [((8, 9, 10, 11), (0, 1, 2, 3), (4, 5, 6, 7)),
              ((12, 13), (8, 9), (10, 11)),
              ((14,), (12,), (13,))]
    for nodes, ch0, ch1 in levels:
        nodes, ch0, ch1 = list(nodes), list(ch0), list(ch1)
        hcat = np.concatenate([h[:, ch0], h[:, ch1]], axis=-1)
        f = _sigmoid(np.einsum('bnc,cd->bnd', hcat, U_fT) + b_f)
        c_red = f[..., :H] * c[:, ch0] + f[..., H:] * c[:, ch1]
        iou = np.einsum('bnc,cd->bnd', hcat, U_iouT) + b_iou
        i, o, u = np.split(iou, 3, axis=-1)
        i, o, u = _sigmoid(i), _sigmoid(o), np.tanh(u)
        c[:, nodes] = i * u + c_red
        h[:, nodes] = o * np.tanh(c[:, nodes])

    return (np.einsum('bnh,hk->bnk', h, linWT) + lin_b).astype(np.float32)


# ----------------------------- main ------------------------------------------

if __name__ == "__main__":
    key = jax.random.PRNGKey(0)
    ks = jax.random.split(key, 10)

    B = 16   # trees; default split is TB=8 trees/step, grid=(2,) (both v7x TCs)

    # Synthetic perfect binary tree, numbered so each level's child-0 nodes
    # precede its child-1 nodes (lets the kernel use contiguous slices):
    #   node 8 <- (0, 4), 9 <- (1, 5), 10 <- (2, 6), 11 <- (3, 7)
    #   node 12 <- (8, 10), 13 <- (9, 11)
    #   node 14 <- (12, 13)
    embedding = jax.random.normal(ks[0], (B, NUM_NODES, X), jnp.float32)
    mask = jnp.broadcast_to(
        jnp.concatenate([jnp.ones((NUM_LEAVES,), jnp.float32),
                         jnp.zeros((NUM_NODES - NUM_LEAVES,), jnp.float32)]),
        (B, NUM_NODES))
    h0 = jax.random.normal(ks[1], (B, NUM_NODES, H), jnp.float32) * 0.1
    c0 = jax.random.normal(ks[2], (B, NUM_NODES, H), jnp.float32) * 0.1

    # Parameters (PyTorch Linear shapes, pre-transposed for the kernel).
    s = 0.1
    W_iouT = (jax.random.normal(ks[3], (3 * H, X), jnp.float32) * s).T      # (X, 3H)
    U_iouT = (jax.random.normal(ks[4], (3 * H, 2 * H), jnp.float32) * s).T  # (2H, 3H)
    b_iou = jax.random.normal(ks[5], (1, 3 * H), jnp.float32) * s
    U_fT = (jax.random.normal(ks[6], (2 * H, 2 * H), jnp.float32) * s).T    # (2H, 2H)
    b_f = jax.random.normal(ks[7], (1, 2 * H), jnp.float32) * s
    linWT = (jax.random.normal(ks[8], (H, H), jnp.float32) * s).T           # (H, H)
    lin_b = jax.random.normal(ks[9], (1, H), jnp.float32) * s
    params = (W_iouT, U_iouT, b_iou, U_fT, b_f, linWT, lin_b)

    logits = jax.jit(tree_lstm_forward)(embedding, mask, h0, c0, params)
    logits = jax.block_until_ready(logits)

    ref = reference_forward_np(embedding, mask, h0, c0, params)

    err = np.max(np.abs(np.asarray(logits) - ref))
    if not np.allclose(np.asarray(logits), ref, atol=1e-2, rtol=1e-2):
        raise AssertionError(
            f"Pallas TreeLSTM output does not match reference (max abs err {err})")

    # TODO(synk): dgl.prop_nodes_topo over arbitrary trees needs a scalar-prefetch
    # (PrefetchScalarGridSpec) schedule table; this kernel uses a static perfect
    # binary-tree schedule (mask is honored only on leaf rows, matching SST use).
    print("KERNEL_OK")
</pallas_src>

<mosaic_0001>
module attributes {stable_mosaic.version = 11 : i64} {
  func.func @fused_tree_lstm_kernel(%arg0: i32, %arg1: memref<64x16xf32, #tpu.memory_space<vmem>>, %arg2: memref<64x1xf32, #tpu.memory_space<vmem>>, %arg3: memref<64x32xf32, #tpu.memory_space<vmem>>, %arg4: memref<16x96xf32, #tpu.memory_space<vmem>>, %arg5: memref<1x96xf32, #tpu.memory_space<vmem>>, %arg6: memref<64x256xf32, #tpu.memory_space<vmem>>, %arg7: memref<1x256xf32, #tpu.memory_space<vmem>>, %arg8: memref<32x32xf32, #tpu.memory_space<vmem>>, %arg9: memref<1x32xf32, #tpu.memory_space<vmem>>, %arg10: memref<120x32xf32, #tpu.memory_space<vmem>>) attributes {dimension_semantics = [#tpu.dimension_semantics<parallel>], iteration_bounds = array<i64: 2>, scalar_prefetch = 0 : i64, scratch_operands = 0 : i64, tpu.core_type = #tpu.core_type<tc>, window_params = [{transform_indices = @transform_0, window_bounds = array<i64: 64, 16>}, {transform_indices = @transform_1, window_bounds = array<i64: 64, 1>}, {transform_indices = @transform_2, window_bounds = array<i64: 64, 32>}, {pipeline_mode = #tpu.pipeline_mode<synchronous>, transform_indices = @transform_3, window_bounds = array<i64: 16, 96>}, {pipeline_mode = #tpu.pipeline_mode<synchronous>, transform_indices = @transform_4, window_bounds = array<i64: 1, 96>}, {pipeline_mode = #tpu.pipeline_mode<synchronous>, transform_indices = @transform_5, window_bounds = array<i64: 64, 256>}, {pipeline_mode = #tpu.pipeline_mode<synchronous>, transform_indices = @transform_6, window_bounds = array<i64: 1, 256>}, {pipeline_mode = #tpu.pipeline_mode<synchronous>, transform_indices = @transform_7, window_bounds = array<i64: 32, 32>}, {pipeline_mode = #tpu.pipeline_mode<synchronous>, transform_indices = @transform_8, window_bounds = array<i64: 1, 32>}, {transform_indices = @transform_9, window_bounds = array<i64: 120, 32>}]} {
    %c0 = arith.constant 0 : index
    %c0_0 = arith.constant 0 : index
    %0 = vector.load %arg1[%c0, %c0_0] : memref<64x16xf32, #tpu.memory_space<vmem>>, vector<64x16xf32>
    %c0_1 = arith.constant 0 : index
    %c0_2 = arith.constant 0 : index
    %1 = vector.load %arg4[%c0_1, %c0_2] : memref<16x96xf32, #tpu.memory_space<vmem>>, vector<16x96xf32>
    %cst = arith.constant dense<0.000000e+00> : vector<64x96xf32>
    %2 = tpu.matmul %0, %1, %cst {dimension_numbers = #tpu.dot_dimension_numbers<[1], [0], [0], [1], [0, 0, 1, 1], [], []>} : vector<64x16xf32>, vector<16x96xf32>, vector<64x96xf32> -> vector<64x96xf32>
    %c0_3 = arith.constant 0 : index
    %c0_4 = arith.constant 0 : index
    %3 = vector.load %arg2[%c0_3, %c0_4] : memref<64x1xf32, #tpu.memory_space<vmem>>, vector<64x1xf32>
    %4 = vector.broadcast %3 : vector<64x1xf32> to vector<64x96xf32>
    %5 = arith.mulf %2, %4 : vector<64x96xf32>
    %c0_5 = arith.constant 0 : index
    %c0_6 = arith.constant 0 : index
    %6 = vector.load %arg5[%c0_5, %c0_6] : memref<1x96xf32, #tpu.memory_space<vmem>>, vector<1x96xf32>
    %7 = vector.broadcast %6 : vector<1x96xf32> to vector<64x96xf32>
    %8 = arith.addf %5, %7 : vector<64x96xf32>
    %9 = vector.extract_strided_slice %8 {offsets = [0, 0], sizes = [64, 32], strides = [1, 1]} : vector<64x96xf32> to vector<64x32xf32>
    %10 = arith.negf %9 : vector<64x32xf32>
    %11 = math.exp %10 : vector<64x32xf32>
    %cst_7 = arith.constant 1.000000e+00 : f32
    %12 = vector.broadcast %cst_7 : f32 to vector<64x32xf32>
    %13 = arith.addf %12, %11 : vector<64x32xf32>
    %14 = arith.divf %12, %13 : vector<64x32xf32>
    %15 = vector.extract_strided_slice %8 {offsets = [0, 32], sizes = [64, 32], strides = [1, 1]} : vector<64x96xf32> to vector<64x32xf32>
    %16 = arith.negf %15 : vector<64x32xf32>
    %17 = math.exp %16 : vector<64x32xf32>
    %cst_8 = arith.constant 1.000000e+00 : f32
    %18 = vector.broadcast %cst_8 : f32 to vector<64x32xf32>
    %19 = arith.addf %18, %17 : vector<64x32xf32>
    %20 = arith.divf %18, %19 : vector<64x32xf32>
    %21 = vector.extract_strided_slice %8 {offsets = [0, 64], sizes = [64, 32], strides = [1, 1]} : vector<64x96xf32> to vector<64x32xf32>
    %22 = math.tanh %21 : vector<64x32xf32>
    %23 = arith.mulf %14, %22 : vector<64x32xf32>
    %c0_9 = arith.constant 0 : index
    %c0_10 = arith.constant 0 : index
    %24 = vector.load %arg3[%c0_9, %c0_10] : memref<64x32xf32, #tpu.memory_space<vmem>>, vector<64x32xf32>
    %25 = arith.addf %23, %24 : vector<64x32xf32>
    %26 = math.tanh %25 : vector<64x32xf32>
    %27 = arith.mulf %20, %26 : vector<64x32xf32>
    %28 = vector.extract_strided_slice %27 {offsets = [0, 0], sizes = [32, 32], strides = [1, 1]} : vector<64x32xf32> to vector<32x32xf32>
    %29 = vector.extract_strided_slice %27 {offsets = [32, 0], sizes = [32, 32], strides = [1, 1]} : vector<64x32xf32> to vector<32x32xf32>
    %30 = vector.extract_strided_slice %25 {offsets = [0, 0], sizes = [32, 32], strides = [1, 1]} : vector<64x32xf32> to vector<32x32xf32>
    %31 = vector.extract_strided_slice %25 {offsets = [32, 0], sizes = [32, 32], strides = [1, 1]} : vector<64x32xf32> to vector<32x32xf32>
    %32 = tpu.concatenate %28, %29 in 1 : vector<32x32xf32>, vector<32x32xf32> -> vector<32x64xf32>
    %c0_11 = arith.constant 0 : index
    %c0_12 = arith.constant 0 : index
    %33 = vector.load %arg6[%c0_11, %c0_12] : memref<64x256xf32, #tpu.memory_space<vmem>>, vector<64x256xf32>
    %cst_13 = arith.constant dense<0.000000e+00> : vector<32x256xf32>
    %34 = tpu.matmul %32, %33, %cst_13 {dimension_numbers = #tpu.dot_dimension_numbers<[1], [0], [0], [1], [0, 0, 1, 1], [], []>} : vector<32x64xf32>, vector<64x256xf32>, vector<32x256xf32> -> vector<32x256xf32>
    %c0_14 = arith.constant 0 : index
    %c0_15 = arith.constant 0 : index
    %35 = vector.load %arg7[%c0_14, %c0_15] : memref<1x256xf32, #tpu.memory_space<vmem>>, vector<1x256xf32>
    %36 = vector.broadcast %35 : vector<1x256xf32> to vector<32x256xf32>
    %37 = arith.addf %34, %36 : vector<32x256xf32>
    %38 = vector.extract_strided_slice %37 {offsets = [0, 0], sizes = [32, 32], strides = [1, 1]} : vector<32x256xf32> to vector<32x32xf32>
    %39 = arith.negf %38 : vector<32x32xf32>
    %40 = math.exp %39 : vector<32x32xf32>
    %cst_16 = arith.constant 1.000000e+00 : f32
    %41 = vector.broadcast %cst_16 : f32 to vector<32x32xf32>
    %42 = arith.addf %41, %40 : vector<32x32xf32>
    %43 = arith.divf %41, %42 : vector<32x32xf32>
    %44 = vector.extract_strided_slice %37 {offsets = [0, 32], sizes = [32, 32], strides = [1, 1]} : vector<32x256xf32> to vector<32x32xf32>
    %45 = arith.negf %44 : vector<32x32xf32>
    %46 = math.exp %45 : vector<32x32xf32>
    %cst_17 = arith.constant 1.000000e+00 : f32
    %47 = vector.broadcast %cst_17 : f32 to vector<32x32xf32>
    %48 = arith.addf %47, %46 : vector<32x32xf32>
    %49 = arith.divf %47, %48 : vector<32x32xf32>
    %50 = vector.extract_strided_slice %37 {offsets = [0, 64], sizes = [32, 32], strides = [1, 1]} : vector<32x256xf32> to vector<32x32xf32>
    %51 = math.tanh %50 : vector<32x32xf32>
    %52 = vector.extract_strided_slice %37 {offsets = [0, 128], sizes = [32, 32], strides = [1, 1]} : vector<32x256xf32> to vector<32x32xf32>
    %53 = arith.negf %52 : vector<32x32xf32>
    %54 = math.exp %53 : vector<32x32xf32>
    %cst_18 = arith.constant 1.000000e+00 : f32
    %55 = vector.broadcast %cst_18 : f32 to vector<32x32xf32>
    %56 = arith.addf %55, %54 : vector<32x32xf32>
    %57 = arith.divf %55, %56 : vector<32x32xf32>
    %58 = vector.extract_strided_slice %37 {offsets = [0, 160], sizes = [32, 32], strides = [1, 1]} : vector<32x256xf32> to vector<32x32xf32>
    %59 = arith.negf %58 : vector<32x32xf32>
    %60 = math.exp %59 : vector<32x32xf32>
    %cst_19 = arith.constant 1.000000e+00 : f32
    %61 = vector.broadcast %cst_19 : f32 to vector<32x32xf32>
    %62 = arith.addf %61, %60 : vector<32x32xf32>
    %63 = arith.divf %61, %62 : vector<32x32xf32>
    %64 = arith.mulf %43, %51 : vector<32x32xf32>
    %65 = arith.mulf %57, %30 : vector<32x32xf32>
    %66 = arith.mulf %63, %31 : vector<32x32xf32>
    %67 = arith.addf %65, %66 : vector<32x32xf32>
    %68 = arith.addf %64, %67 : vector<32x32xf32>
    %69 = math.tanh %68 : vector<32x32xf32>
    %70 = arith.mulf %49, %69 : vector<32x32xf32>
    %71 = vector.extract_strided_slice %70 {offsets = [0, 0], sizes = [16, 32], strides = [1, 1]} : vector<32x32xf32> to vector<16x32xf32>
    %72 = vector.extract_strided_slice %70 {offsets = [16, 0], sizes = [16, 32], strides = [1, 1]} : vector<32x32xf32> to vector<16x32xf32>
    %73 = vector.extract_strided_slice %68 {offsets = [0, 0], sizes = [16, 32], strides = [1, 1]} : vector<32x32xf32> to vector<16x32xf32>
    %74 = vector.extract_strided_slice %68 {offsets = [16, 0], sizes = [16, 32], strides = [1, 1]} : vector<32x32xf32> to vector<16x32xf32>
    %75 = tpu.concatenate %71, %72 in 1 : vector<16x32xf32>, vector<16x32xf32> -> vector<16x64xf32>
    %c0_20 = arith.constant 0 : index
    %c0_21 = arith.constant 0 : index
    %76 = vector.load %arg6[%c0_20, %c0_21] : memref<64x256xf32, #tpu.memory_space<vmem>>, vector<64x256xf32>
    %cst_22 = arith.constant dense<0.000000e+00> : vector<16x256xf32>
    %77 = tpu.matmul %75, %76, %cst_22 {dimension_numbers = #tpu.dot_dimension_numbers<[1], [0], [0], [1], [0, 0, 1, 1], [], []>} : vector<16x64xf32>, vector<64x256xf32>, vector<16x256xf32> -> vector<16x256xf32>
    %c0_23 = arith.constant 0 : index
    %c0_24 = arith.constant 0 : index
    %78 = vector.load %arg7[%c0_23, %c0_24] : memref<1x256xf32, #tpu.memory_space<vmem>>, vector<1x256xf32>
    %79 = vector.broadcast %78 : vector<1x256xf32> to vector<16x256xf32>
    %80 = arith.addf %77, %79 : vector<16x256xf32>
    %81 = vector.extract_strided_slice %80 {offsets = [0, 0], sizes = [16, 32], strides = [1, 1]} : vector<16x256xf32> to vector<16x32xf32>
    %82 = arith.negf %81 : vector<16x32xf32>
    %83 = math.exp %82 : vector<16x32xf32>
    %cst_25 = arith.constant 1.000000e+00 : f32
    %84 = vector.broadcast %cst_25 : f32 to vector<16x32xf32>
    %85 = arith.addf %84, %83 : vector<16x32xf32>
    %86 = arith.divf %84, %85 : vector<16x32xf32>
    %87 = vector.extract_strided_slice %80 {offsets = [0, 32], sizes = [16, 32], strides = [1, 1]} : vector<16x256xf32> to vector<16x32xf32>
    %88 = arith.negf %87 : vector<16x32xf32>
    %89 = math.exp %88 : vector<16x32xf32>
    %cst_26 = arith.constant 1.000000e+00 : f32
    %90 = vector.broadcast %cst_26 : f32 to vector<16x32xf32>
    %91 = arith.addf %90, %89 : vector<16x32xf32>
    %92 = arith.divf %90, %91 : vector<16x32xf32>
    %93 = vector.extract_strided_slice %80 {offsets = [0, 64], sizes = [16, 32], strides = [1, 1]} : vector<16x256xf32> to vector<16x32xf32>
    %94 = math.tanh %93 : vector<16x32xf32>
    %95 = vector.extract_strided_slice %80 {offsets = [0, 128], sizes = [16, 32], strides = [1, 1]} : vector<16x256xf32> to vector<16x32xf32>
    %96 = arith.negf %95 : vector<16x32xf32>
    %97 = math.exp %96 : vector<16x32xf32>
    %cst_27 = arith.constant 1.000000e+00 : f32
    %98 = vector.broadcast %cst_27 : f32 to vector<16x32xf32>
    %99 = arith.addf %98, %97 : vector<16x32xf32>
    %100 = arith.divf %98, %99 : vector<16x32xf32>
    %101 = vector.extract_strided_slice %80 {offsets = [0, 160], sizes = [16, 32], strides = [1, 1]} : vector<16x256xf32> to vector<16x32xf32>
    %102 = arith.negf %101 : vector<16x32xf32>
    %103 = math.exp %102 : vector<16x32xf32>
    %cst_28 = arith.constant 1.000000e+00 : f32
    %104 = vector.broadcast %cst_28 : f32 to vector<16x32xf32>
    %105 = arith.addf %104, %103 : vector<16x32xf32>
    %106 = arith.divf %104, %105 : vector<16x32xf32>
    %107 = arith.mulf %86, %94 : vector<16x32xf32>
    %108 = arith.mulf %100, %73 : vector<16x32xf32>
    %109 = arith.mulf %106, %74 : vector<16x32xf32>
    %110 = arith.addf %108, %109 : vector<16x32xf32>
    %111 = arith.addf %107, %110 : vector<16x32xf32>
    %112 = math.tanh %111 : vector<16x32xf32>
    %113 = arith.mulf %92, %112 : vector<16x32xf32>
    %114 = vector.extract_strided_slice %113 {offsets = [0, 0], sizes = [8, 32], strides = [1, 1]} : vector<16x32xf32> to vector<8x32xf32>
    %115 = vector.extract_strided_slice %113 {offsets = [8, 0], sizes = [8, 32], strides = [1, 1]} : vector<16x32xf32> to vector<8x32xf32>
    %116 = vector.extract_strided_slice %111 {offsets = [0, 0], sizes = [8, 32], strides = [1, 1]} : vector<16x32xf32> to vector<8x32xf32>
    %117 = vector.extract_strided_slice %111 {offsets = [8, 0], sizes = [8, 32], strides = [1, 1]} : vector<16x32xf32> to vector<8x32xf32>
    %118 = tpu.concatenate %114, %115 in 1 : vector<8x32xf32>, vector<8x32xf32> -> vector<8x64xf32>
    %c0_29 = arith.constant 0 : index
    %c0_30 = arith.constant 0 : index
    %119 = vector.load %arg6[%c0_29, %c0_30] : memref<64x256xf32, #tpu.memory_space<vmem>>, vector<64x256xf32>
    %cst_31 = arith.constant dense<0.000000e+00> : vector<8x256xf32>
    %120 = tpu.matmul %118, %119, %cst_31 {dimension_numbers = #tpu.dot_dimension_numbers<[1], [0], [0], [1], [0, 0, 1, 1], [], []>} : vector<8x64xf32>, vector<64x256xf32>, vector<8x256xf32> -> vector<8x256xf32>
    %c0_32 = arith.constant 0 : index
    %c0_33 = arith.constant 0 : index
    %121 = vector.load %arg7[%c0_32, %c0_33] : memref<1x256xf32, #tpu.memory_space<vmem>>, vector<1x256xf32>
    %122 = vector.broadcast %121 : vector<1x256xf32> to vector<8x256xf32>
    %123 = arith.addf %120, %122 : vector<8x256xf32>
    %124 = vector.extract_strided_slice %123 {offsets = [0, 0], sizes = [8, 32], strides = [1, 1]} : vector<8x256xf32> to vector<8x32xf32>
    %125 = arith.negf %124 : vector<8x32xf32>
    %126 = math.exp %125 : vector<8x32xf32>
    %cst_34 = arith.constant 1.000000e+00 : f32
    %127 = vector.broadcast %cst_34 : f32 to vector<8x32xf32>
    %128 = arith.addf %127, %126 : vector<8x32xf32>
    %129 = arith.divf %127, %128 : vector<8x32xf32>
    %130 = vector.extract_strided_slice %123 {offsets = [0, 32], sizes = [8, 32], strides = [1, 1]} : vector<8x256xf32> to vector<8x32xf32>
    %131 = arith.negf %130 : vector<8x32xf32>
    %132 = math.exp %131 : vector<8x32xf32>
    %cst_35 = arith.constant 1.000000e+00 : f32
    %133 = vector.broadcast %cst_35 : f32 to vector<8x32xf32>
    %134 = arith.addf %133, %132 : vector<8x32xf32>
    %135 = arith.divf %133, %134 : vector<8x32xf32>
    %136 = vector.extract_strided_slice %123 {offsets = [0, 64], sizes = [8, 32], strides = [1, 1]} : vector<8x256xf32> to vector<8x32xf32>
    %137 = math.tanh %136 : vector<8x32xf32>
    %138 = vector.extract_strided_slice %123 {offsets = [0, 128], sizes = [8, 32], strides = [1, 1]} : vector<8x256xf32> to vector<8x32xf32>
    %139 = arith.negf %138 : vector<8x32xf32>
    %140 = math.exp %139 : vector<8x32xf32>
    %cst_36 = arith.constant 1.000000e+00 : f32
    %141 = vector.broadcast %cst_36 : f32 to vector<8x32xf32>
    %142 = arith.addf %141, %140 : vector<8x32xf32>
    %143 = arith.divf %141, %142 : vector<8x32xf32>
    %144 = vector.extract_strided_slice %123 {offsets = [0, 160], sizes = [8, 32], strides = [1, 1]} : vector<8x256xf32> to vector<8x32xf32>
    %145 = arith.negf %144 : vector<8x32xf32>
    %146 = math.exp %145 : vector<8x32xf32>
    %cst_37 = arith.constant 1.000000e+00 : f32
    %147 = vector.broadcast %cst_37 : f32 to vector<8x32xf32>
    %148 = arith.addf %147, %146 : vector<8x32xf32>
    %149 = arith.divf %147, %148 : vector<8x32xf32>
    %150 = arith.mulf %129, %137 : vector<8x32xf32>
    %151 = arith.mulf %143, %116 : vector<8x32xf32>
    %152 = arith.mulf %149, %117 : vector<8x32xf32>
    %153 = arith.addf %151, %152 : vector<8x32xf32>
    %154 = arith.addf %150, %153 : vector<8x32xf32>
    %155 = math.tanh %154 : vector<8x32xf32>
    %156 = arith.mulf %135, %155 : vector<8x32xf32>
    %157 = tpu.concatenate %27, %70, %113, %156 in 0 : vector<64x32xf32>, vector<32x32xf32>, vector<16x32xf32>, vector<8x32xf32> -> vector<120x32xf32>
    %c0_38 = arith.constant 0 : index
    %c0_39 = arith.constant 0 : index
    %158 = vector.load %arg8[%c0_38, %c0_39] : memref<32x32xf32, #tpu.memory_space<vmem>>, vector<32x32xf32>
    %cst_40 = arith.constant dense<0.000000e+00> : vector<120x32xf32>
    %159 = tpu.matmul %157, %158, %cst_40 {dimension_numbers = #tpu.dot_dimension_numbers<[1], [0], [0], [1], [0, 0, 1, 1], [], []>} : vector<120x32xf32>, vector<32x32xf32>, vector<120x32xf32> -> vector<120x32xf32>
    %c0_41 = arith.constant 0 : index
    %c0_42 = arith.constant 0 : index
    %160 = vector.load %arg9[%c0_41, %c0_42] : memref<1x32xf32, #tpu.memory_space<vmem>>, vector<1x32xf32>
    %161 = vector.broadcast %160 : vector<1x32xf32> to vector<120x32xf32>
    %162 = arith.addf %159, %161 : vector<120x32xf32>
    %c0_43 = arith.constant 0 : index
    %c0_44 = arith.constant 0 : index
    %163 = vector.load %arg10[%c0_43, %c0_44] : memref<120x32xf32, #tpu.memory_space<vmem>>, vector<120x32xf32>
    tpu.vector_store %arg10[%c0_43, %c0_44], %162 {strides = array<i32>} : memref<120x32xf32, #tpu.memory_space<vmem>>, vector<120x32xf32>,
    return
  }
  func.func @transform_0(%arg0: i32) -> (i32, i32) {
    %c0_i32 = arith.constant 0 : i32
    %c0_i32_0 = arith.constant 0 : i32
    return %arg0, %c0_i32 : i32, i32
  }
  func.func @transform_1(%arg0: i32) -> (i32, i32) {
    %c0_i32 = arith.constant 0 : i32
    %c0_i32_0 = arith.constant 0 : i32
    return %arg0, %c0_i32 : i32, i32
  }
  func.func @transform_2(%arg0: i32) -> (i32, i32) {
    %c0_i32 = arith.constant 0 : i32
    %c0_i32_0 = arith.constant 0 : i32
    return %arg0, %c0_i32 : i32, i32
  }
  func.func @transform_3(%arg0: i32) -> (i32, i32) {
    %c0_i32 = arith.constant 0 : i32
    %c0_i32_0 = arith.constant 0 : i32
    %c0_i32_1 = arith.constant 0 : i32
    return %c0_i32, %c0_i32_0 : i32, i32
  }
  func.func @transform_4(%arg0: i32) -> (i32, i32) {
    %c0_i32 = arith.constant 0 : i32
    %c0_i32_0 = arith.constant 0 : i32
    %c0_i32_1 = arith.constant 0 : i32
    return %c0_i32, %c0_i32_0 : i32, i32
  }
  func.func @transform_5(%arg0: i32) -> (i32, i32) {
    %c0_i32 = arith.constant 0 : i32
    %c0_i32_0 = arith.constant 0 : i32
    %c0_i32_1 = arith.constant 0 : i32
    return %c0_i32, %c0_i32_0 : i32, i32
  }
  func.func @transform_6(%arg0: i32) -> (i32, i32) {
    %c0_i32 = arith.constant 0 : i32
    %c0_i32_0 = arith.constant 0 : i32
    %c0_i32_1 = arith.constant 0 : i32
    return %c0_i32, %c0_i32_0 : i32, i32
  }
  func.func @transform_7(%arg0: i32) -> (i32, i32) {
    %c0_i32 = arith.constant 0 : i32
    %c0_i32_0 = arith.constant 0 : i32
    %c0_i32_1 = arith.constant 0 : i32
    return %c0_i32, %c0_i32_0 : i32, i32
  }
  func.func @transform_8(%arg0: i32) -> (i32, i32) {
    %c0_i32 = arith.constant 0 : i32
    %c0_i32_0 = arith.constant 0 : i32
    %c0_i32_1 = arith.constant 0 : i32
    return %c0_i32, %c0_i32_0 : i32, i32
  }
  func.func @transform_9(%arg0: i32) -> (i32, i32) {
    %c0_i32 = arith.constant 0 : i32
    %c0_i32_0 = arith.constant 0 : i32
    return %arg0, %c0_i32 : i32, i32
  }
}

</mosaic_0001>

<bundles_post_ra>
// kernel: tree_lstm_forward.1
= control target key start
LH: loop header
LB: loop body
LE: loop exit
PB: predicated region body
PF: predicated region fallthrough
CT: control target
= control target key end

     0   :  { %s2084_s30 = smov 0   ;;  %s2594_s0 = inlined_call_operand.vmem [shape: f32[128,16], index: 0, kind: input, shape index: {}]   ;;  %s2595_s1 = inlined_call_operand.vmem [shape: f32[128,1], index: 1, kind: input, shape index: {}]   ;;  %s2596_s2 = inlined_call_operand.vmem [shape: f32[128,32], index: 2, kind: input, shape index: {}]   ;;  %s2597_s3 = inlined_call_operand.vmem [shape: f32[16,96], index: 3, kind: input, shape index: {}]   ;;  %s2598_s4 = inlined_call_operand.vmem [shape: f32[1,96], index: 4, kind: input, shape index: {}]   ;;  %s2599_s5 = inlined_call_operand.vmem [shape: f32[64,256], index: 5, kind: input, shape index: {}]   ;;  %s2600_s6 = inlined_call_operand.vmem [shape: f32[1,256], index: 6, kind: input, shape index: {}]   ;;  %s2601_s7 = inlined_call_operand.vmem [shape: f32[32,32], index: 7, kind: input, shape index: {}]   ;;  %s2602_s8 = inlined_call_operand.vmem [shape: f32[1,32], index: 8, kind: input, shape index: {}]   ;;  %s2603_s9 = inlined_call_operand.vmem [shape: f32[240,32], index: 9, kind: output, shape index: {}]  }
   0x1 LB: > { %s1626_s10 = sadd.s32 4294967295, %s2025_s30   ;;  %p1630_p0 = scmp.ge.s32.totalorder %s2025_s30, 1  ;;  %s2025_s30 = sphi %s2084_s30, %s19_s30  }
   0x2   : > { %p310_p1 = scmp.lt.s32.totalorder %s2025_s30, 3 }
   0x4   : > { %p311_p2 = pnand %p1630_p0, %p310_p1 }
   0x5   : > { %v388_v0 = vld [vmem:[%s2597_s3] sm:$0xff] (!%p311_p2)  ;;  %v389_v1 = vld [vmem:[%s2597_s3 + $0x8] sm:$0xff] (!%p311_p2)  ;;  %s1631_s15 = sshll.u32 (!%p311_p2), %s1626_s10, 3  ;;  %v2027_v3 = vmov (!%p311_p2), 0   ;;  %vm390_vm0 = vcmask (!%p311_p2), 130048   ;;  %s2028_s25 = smov (!%p311_p2), 64  }
   0x6   : > { %314 = sbr.rel (%p311_p2) target bundleno = 2641 (0xa51), region = 56  ;;  %v1792_v2 = vpack.c.bf16 (!%p311_p2), %v389_v1, %v388_v0  ;;  %p357_p3 = scmp.lt.s32.totalorder (!%p311_p2), %s1631_s15, 15  ;;  %1869 = vset.pattern.permute.xlu0 (!%p311_p2), %v2027_v3  ;;  %1870 = vset.pattern.permute.xlu1 (!%p311_p2), %v2027_v3  ;;  %v2129_v20 = vld [vmem:[%s2598_s4] ss:$0 sm:$0xff] (!%p311_p2)  ;;  %vm767_vm1 = vcmask (!%p311_p2), 261120   ;;  %vm800_vm2 = vcmask (!%p311_p2), 523264  }
   0x7   : > { %s2029_s29 = smov (!%p311_p2), 32   ;;  %s2031_s11 = smov (!%p311_p2), 96   ;;  %vm2033_vm3 = vmmov (!%p311_p2), 0  }
   0x8   : > { %1793 = vmatprep.subr.bf16.mxu0 (!%p311_p2), %v1792_v2  ;;  %s374_s21 = smul.u32 (!%p311_p2), 15, %s1626_s10 }
   0x9   : > { %1795 = vmatpush3.bf16.msra.mxu0 (!%p311_p2), %v1792_v2 }
   0xa   : > { %p375_p4 = scmp.lt.s32.totalorder (!%p311_p2), %s374_s21, 29 }
   0xd   : > { %s2605_s15 = smov (!%p357_p3, %s1631_s15), 15  ;;  %s2607_s21 = smov (!%p375_p4, %s374_s21), 29 }
   0xe   : > { %s2100_s16 = sshll.u32 %s2605_s15, 3 }
   0xf   : > { %s360_s19 = scalar_lea.vmem %s2594_s0, %s2100_s16  ;;  %s2110_s22 = scalar_lea.vmem %s2595_s1, %s2100_s16 }
  0x10   : > { %v380_v4 = vld [vmem:[%s360_s19] sm:$0xff]  ;;  %v381_v5 = vld [vmem:[%s360_s19 + $0x8] sm:$0xff]  ;;  %v382_v6 = vld [vmem:[%s360_s19 + $0x10] sm:$0xff]  ;;  %s2149_s28 = scalar_lea.vmem %s2596_s2, %s2100_s16 }
  0x11   : > { %1727 = vmatprep.mubr.msk.f32.mxu0 %vm390_vm0, %v380_v4  ;;  %v520_v7 = vld [vmem:[%s2110_s22] sm:$0xff]  ;;  %v522_v8 = vld [vmem:[%s2110_s22 + $0x10] sm:$0xff]  ;;  %v383_v9 = vld [vmem:[%s360_s19 + $0x18] sm:$0xff] }
  0x12   : > { %1728 = vmatmul.mubr.msk.f32.vlgmr.msra.gmra.mrb[0].mxu0 %vm390_vm0, %v381_v5  ;;  %530 = vperm.xlu0 %1869, %v520_v7   ;;  %v384_v10 = vld [vmem:[%s360_s19 + $0x20] sm:$0xff]  ;;  %v521_v11 = vld [vmem:[%s2110_s22 + $0x8] sm:$0xff]  ;;  %v386_v14 = vld [vmem:[%s360_s19 + $0x30] sm:$0xff] }
  0x13   : > { %1730 = vmatprep.mubr.msk.f32.mxu0 %vm390_vm0, %v382_v6  ;;  %540 = vperm.xlu1 %1870, %v522_v8   ;;  %v524_v12 = vld [vmem:[%s2110_s22 + $0x20] sm:$0xff]  ;;  %v385_v13 = vld [vmem:[%s360_s19 + $0x28] sm:$0xff]  ;;  %v387_v16 = vld [vmem:[%s360_s19 + $0x38] sm:$0xff] }
  0x14   : > { %v525_v15 = vld [vmem:[%s2110_s22 + $0x28] sm:$0xff]  ;;  %v526_v17 = vld [vmem:[%s2110_s22 + $0x30] sm:$0xff]  ;;  %v523_v40 = vld [vmem:[%s2110_s22 + $0x18] sm:$0xff] }
  0x15   : > { %v527_v44 = vld [vmem:[%s2110_s22 + $0x38] sm:$0xff]  ;;  %v687_v55 = vld [vmem:[%s2149_s28] sm:$0xff]  ;;  %v689_v6 = vld [vmem:[%s2149_s28 + $0x10] sm:$0xff]  ;;  %s1637_s22 = sshll.u32 %s2607_s21, 3 }
  0x16   : > { %1731 = vmatmul.mubr.msk.f32.gmra.mrb[2].mxu0 %vm390_vm0, %v383_v9  ;;  %535 = vperm.xlu0 %1869, %v521_v11   ;;  %s2471_s27 = scalar_lea.vmem %s2603_s9, %s1637_s22 }
  0x17   : > { %1733 = vmatprep.mubr.msk.f32.mxu0 %vm390_vm0, %v384_v10  ;;  %550 = vperm.xlu1 %1870, %v524_v12  }
  0x1a   : > { %1734 = vmatmul.mubr.msk.f32.gmra.mrb[4].mxu0 %vm390_vm0, %v385_v13 }
  0x1b   : > { %1736 = vmatprep.mubr.msk.f32.mxu0 %vm390_vm0, %v386_v14  ;;  %555 = vperm.xlu1 %1870, %v525_v15   ;;  %v688_v15 = vld [vmem:[%s2149_s28 + $0x8] sm:$0xff] }
  0x1e   : > { %1737 = vmatmul.mubr.msk.f32.gmra.mrb[6].mxu0 %vm390_vm0, %v387_v16 }
  0x1f   : > { %560 = vperm.xlu1 %1870, %v526_v17  }
  0x91   : > { %v531_v18 = vpop.permute.xlu0 %530 }
  0x92   : > { %v541_v22 = vpop.permute.xlu1 %540 }
  0x95   : > { %v536_v24 = vpop.permute.xlu0 %535 }
  0x96   : > { %v551_v30 = vpop.permute.xlu1 %550 }
  0x9a   : > { %v556_v53 = vpop.permute.xlu1 %555 }
  0x9e   : > { %v561_v59 = vpop.permute.xlu1 %560 }
  0xe5   : > { %v1729_v19 = vpop.f32.mrb[0].mxu0 }
  0xe6   : > { %v481_v21 = vpop.f32.mrb[1].mxu0  ;;  %v569_v28 = vmul.f32 %v1729_v19, %v536_v24 }
  0xe7   : > { %v568_v23 = vmul.f32 %v531_v18, %v481_v21 }
  0xe8   : > { %v584_v34 = vadd.f32 %v2129_v20, %v569_v28 }
  0xe9   : > { %v583_v25 = vadd.f32 %v2129_v20, %v568_v23  ;;  %v2132_v26 = vpop.f32.mrb[2].mxu0 }
  0xea   : > { %v491_v27 = vpop.f32.mrb[3].mxu0  ;;  %v1648_v50 = vmul.f32 -1.442695, %v584_v34 }
  0xeb   : > { %1871 = vtanh.f32 %v583_v25  ;;  %v570_v29 = vmul.f32 %v541_v22, %v491_v27  ;;  %v1647_v45 = vmul.f32 -1.442695, %v583_v25  ;;  %v691_v22 = vld [vmem:[%s2149_s28 + $0x20] sm:$0xff] }
  0xed   : > { %v585_v31 = vadd.f32 %v2129_v20, %v570_v29  ;;  %v1735_v32 = vpop.f32.mrb[4].mxu0 }
  0xee   : > { %v501_v33 = vpop.f32.mrb[5].mxu0  ;;  %v573_v57 = vmul.f32 %v1735_v32, %v556_v53 }
  0xef   : > { %1873 = vtanh.f32 %v585_v31  ;;  %v572_v35 = vmul.f32 %v551_v30, %v501_v33  ;;  %v1649_v46 = vmul.f32 -1.442695, %v585_v31 }
  0xf0   : > { %1875 = vtanh.f32 %v584_v34  ;;  %v2158_v62 = vadd.f32 %v2129_v20, %v573_v57  ;;  %v773_v34 = vld [vmem:[%s2599_s5 + $0x8] sm:$0xff] }
  0xf1   : > { %v587_v36 = vadd.f32 %v2129_v20, %v572_v35  ;;  %v2137_v37 = vpop.f32.mrb[6].mxu0  ;;  %v772_v35 = vld [vmem:[%s2599_s5] sm:$0xff] }
  0xf2   : > { %v511_v38 = vpop.f32.mrb[7].mxu0 }
  0xf3   : > { %1877 = vtanh.f32 %v587_v36  ;;  %v1651_v52 = vmul.f32 -1.442695, %v587_v36  ;;  %v574_v63 = vmul.f32 %v561_v59, %v511_v38  ;;  %v777_v38 = vld [vmem:[%s2599_s5 + $0x28] sm:$0xff] }
  0xf4   : > { %1879 = vpow2.f32 %v1647_v45  ;;  %v783_v45 = vld [vmem:[%s2599_s5 + $0x58] sm:$0xff] }
  0xf5   : > { %v1872_v39 = vpop.eup %1871  ;;  %1881 = vpow2.f32 %v1649_v46  ;;  %v2165_v4 = vadd.f32 %v2129_v20, %v574_v63 }
  0xf6   : > { %655 = vrot.lane.b32.xlu0 %v1872_v39, %s2028_s25  ;;  %v779_v39 = vld [vmem:[%s2599_s5 + $0x38] sm:$0xff] }
  0xf7   : > { %v1653_v59 = vmul.f32 -1.442695, %v2165_v4 }
  0xf9   : > { %v1874_v41 = vpop.eup %1873 }
  0xfa   : > { %545 = vperm.xlu0 %1869, %v523_v40   ;;  %659 = vrot.lane.b32.xlu1 %v1874_v41, %s2028_s25  ;;  %v1876_v42 = vpop.eup %1875  ;;  %v2225_v41 = vpack.c.bf16 %v779_v39, %v777_v38 }
  0xfd   : > { %v1878_v43 = vpop.eup %1877 }
  0xfe   : > { %657 = vrot.lane.b32.xlu0 %v1876_v42, %s2028_s25  ;;  %v1880_v47 = vpop.eup %1879  ;;  %v776_v42 = vld [vmem:[%s2599_s5 + $0x20] sm:$0xff] }
  0xff   : > { %v615_v48 = vadd.f32 1.0, %v1880_v47  ;;  %v1882_v49 = vpop.eup %1881 }
 0x100   : > { %v617_v51 = vadd.f32 1.0, %v1882_v49  ;;  %v782_v49 = vld [vmem:[%s2599_s5 + $0x50] sm:$0xff] }
 0x101   : > { %1883 = vrcp.f32 %v615_v48  ;;  %v780_v48 = vld [vmem:[%s2599_s5 + $0x40] sm:$0xff] }
 0x102   : > { %663 = vrot.lane.b32.xlu0 %v1878_v43, %s2028_s25  ;;  %1885 = vpow2.f32 %v1648_v50  ;;  %v778_v43 = vld [vmem:[%s2599_s5 + $0x30] sm:$0xff]  ;;  %v785_v50 = vld [vmem:[%s2599_s5 + $0x68] sm:$0xff] }
 0x103   : > { %1887 = vrcp.f32 %v617_v51  ;;  %v2240_v46 = vpack.c.bf16 %v778_v43, %v776_v42  ;;  %v787_v51 = vld [vmem:[%s2599_s5 + $0x78] sm:$0xff] }
 0x104   : > { %1889 = vpow2.f32 %v1651_v52  ;;  %v2260_v52 = vpack.c.bf16 %v782_v49, %v780_v48  ;;  %v2264_v53 = vpack.c.bf16 %v787_v51, %v785_v50 }
 0x106   : > { %565 = vperm.xlu0 %1869, %v527_v44   ;;  %v781_v44 = vld [vmem:[%s2599_s5 + $0x48] sm:$0xff] }
 0x107   : > { %v2244_v47 = vpack.c.bf16 %v783_v45, %v781_v44 }
 0x10b   : > { %v2151_v54 = vpop.eup %1883 }
 0x10c   : > { %v1886_v61 = vpop.eup %1885 }
 0x10d   : > { %v2161_v0 = vpop.eup %1887  ;;  %v616_v2 = vadd.f32 1.0, %v1886_v61 }
 0x10e   : > { %v1890_v3 = vpop.eup %1889 }
 0x10f   : > { %v619_v7 = vadd.f32 1.0, %v1890_v3 }
 0x168   : > { %v656_v56 = vpop.permute.xlu0 %655 }
 0x169   : > { %v679_v58 = vmul.f32 %v2151_v54, %v656_v56  ;;  %v786_v56 = vld [vmem:[%s2599_s5 + $0x70] sm:$0xff] }
 0x16b   : > { %v2155_v60 = vadd.f32 %v687_v55, %v679_v58  ;;  %v784_v55 = vld [vmem:[%s2599_s5 + $0x60] sm:$0xff]  ;;  %v1652_v58 = vmul.f32 -1.442695, %v2158_v62 }
 0x16c   : > { %v660_v1 = vpop.permute.xlu1 %659  ;;  %v2274_v57 = vpack.c.bf16 %v786_v56, %v784_v55 }
 0x16d   : > { %1891 = vtanh.f32 %v2155_v60  ;;  %v681_v5 = vmul.f32 %v2161_v0, %v660_v1 }
 0x16e   : > { %1893 = vtanh.f32 %v2158_v62 }
 0x16f   : > { %1895 = vrcp.f32 %v616_v2  ;;  %v2170_v8 = vadd.f32 %v689_v6, %v681_v5  ;;  %v2030_v2 = vmov 0.0  }
 0x170   : > { %1897 = vtanh.f32 %v2165_v4  ;;  %877 = vmatprep.mubr.f32.mxu1 %v2030_v2  ;;  %1126 = vmatprep.mubr.f32.mxu0 %v2030_v2 }
 0x171   : > { %1899 = vrcp.f32 %v619_v7 }
 0x172   : > { %1901 = vtanh.f32 %v2170_v8 }
 0x177   : > { %v1892_v9 = vpop.eup %1891 }
 0x178   : > { %719 = vrot.lane.b32.xlu1 %v1892_v9, %s2029_s29  ;;  %v1894_v12 = vpop.eup %1893 }
 0x179   : > { %v546_v10 = vpop.permute.xlu0 %545  ;;  %v2179_v14 = vpop.eup %1895 }
 0x17a   : > { %v571_v11 = vmul.f32 %v2132_v26, %v546_v10  ;;  %v1898_v18 = vpop.eup %1897 }
 0x17b   : > { %v2187_v21 = vpop.eup %1899 }
 0x17c   : > { %v2176_v13 = vadd.f32 %v2129_v20, %v571_v11  ;;  %665 = vrot.lane.b32.xlu1 %v1894_v12, %s2028_s25  ;;  %v1902_v25 = vpop.eup %1901  ;;  %v692_v11 = vld [vmem:[%s2149_s28 + $0x28] sm:$0xff] }
 0x17d   : > { %v658_v16 = vpop.permute.xlu0 %657 }
 0x17e   : > { %1903 = vtanh.f32 %v2176_v13  ;;  %v680_v17 = vmul.f32 %v2179_v14, %v658_v16  ;;  %v1650_v61 = vmul.f32 -1.442695, %v2176_v13 }
 0x180   : > { %v2184_v19 = vadd.f32 %v688_v15, %v680_v17  ;;  %667 = vrot.lane.b32.xlu1 %v1898_v18, %s2028_s25 }
 0x181   : > { %v664_v23 = vpop.permute.xlu0 %663 }
 0x182   : > { %1905 = vtanh.f32 %v2184_v19  ;;  %v683_v24 = vmul.f32 %v2187_v21, %v664_v23 }
 0x184   : > { %v2192_v26 = vadd.f32 %v691_v22, %v683_v24  ;;  %723 = vrot.lane.b32.xlu1 %v1902_v25, %s2029_s29  ;;  %v693_v22 = vld [vmem:[%s2149_s28 + $0x30] sm:$0xff] }
 0x185   : > { %v566_v27 = vpop.permute.xlu0 %565 }
 0x186   : > { %1907 = vtanh.f32 %v2192_v26  ;;  %v575_v28 = vmul.f32 %v2137_v37, %v566_v27  ;;  %v774_v37 = vld [vmem:[%s2599_s5 + $0x10] sm:$0xff]  ;;  %v690_v27 = vld [vmem:[%s2149_s28 + $0x18] sm:$0xff] }
 0x187   : > { %v2223_v40 = vpack.c.bf16 %v774_v37, %v772_v35 }
 0x188   : > { %v1904_v29 = vpop.eup %1903  ;;  %v2198_v30 = vadd.f32 %v2129_v20, %v575_v28  ;;  %v775_v20 = vld [vmem:[%s2599_s5 + $0x18] sm:$0xff] }
 0x189   : > { %661 = vrot.lane.b32.xlu0 %v1904_v29, %s2028_s25  ;;  %v1796_v36 = vpack.c.bf16 %v775_v20, %v773_v34 }
 0x18a   : > { %1909 = vtanh.f32 %v2198_v30  ;;  %v1654_v62 = vmul.f32 -1.442695, %v2198_v30 }
 0x18b   : > { %1797 = vmatprep.subr.bf16.mxu1 %v1796_v36  ;;  %1813 = vmatprep.subr.bf16.mxu0 %v1796_v36  ;;  %1911 = vpow2.f32 %v1652_v58  ;;  %v790_v58 = vlaneseq }
 0x18c   : > { %v1906_v31 = vpop.eup %1905  ;;  %1799 = vmatpush1.bf16.msra.mxu1 %v2223_v40  ;;  %1815 = vmatpush1.bf16.msra.mxu0 %v2223_v40  ;;  %1913 = vpow2.f32 %v1653_v59 }
 0x18d   : > { %721 = vrot.lane.b32.xlu0 %v1906_v31, %s2029_s29  ;;  %1801 = vmatprep.subr.bf16.mxu1 %v2225_v41  ;;  %1915 = vpow2.f32 %v1650_v61  ;;  %v791_v59 = vshrl.u32 %v790_v58, 7 }
 0x18e   : > { %1817 = vmatprep.subr.bf16.mxu0 %v2225_v41 }
 0x18f   : > { %v792_v61 = vsub.s32 0, %v791_v59 }
 0x190   : > { %v1908_v32 = vpop.eup %1907  ;;  %1803 = vmatpush1.bf16.msra.mxu1 %v2240_v46  ;;  %1819 = vmatpush1.bf16.msra.mxu0 %v2240_v46 }
 0x191   : > { %727 = vrot.lane.b32.xlu0 %v1908_v32, %s2029_s29  ;;  %1805 = vmatprep.subr.bf16.mxu1 %v2244_v47 }
 0x192   : > { %1821 = vmatprep.subr.bf16.mxu0 %v2244_v47 }
 0x194   : > { %v1910_v33 = vpop.eup %1909  ;;  %1807 = vmatpush1.bf16.msra.mxu1 %v2260_v52  ;;  %1823 = vmatpush1.bf16.msra.mxu0 %v2260_v52 }
 0x195   : > { %669 = vrot.lane.b32.xlu0 %v1910_v33, %s2028_s25  ;;  %1809 = vmatprep.subr.bf16.mxu1 %v2264_v53  ;;  %v1912_v63 = vpop.eup %1911 }
 0x196   : > { %1825 = vmatprep.subr.bf16.mxu0 %v2264_v53  ;;  %v620_v1 = vadd.f32 1.0, %v1912_v63  ;;  %v1914_v3 = vpop.eup %1913  ;;  %v788_v63 = vld [vmem:[%s2600_s6] sm:$0x3] }
 0x197   : > { %v621_v5 = vadd.f32 1.0, %v1914_v3  ;;  %v1916_v6 = vpop.eup %1915  ;;  %v2360_v3 = vrot.slane %v788_v63, %v792_v61 }
 0x198   : > { %1811 = vmatpush1.bf16.msra.mxu1 %v2274_v57  ;;  %1827 = vmatpush1.bf16.msra.mxu0 %v2274_v57  ;;  %1917 = vrcp.f32 %v620_v1  ;;  %v618_v9 = vadd.f32 1.0, %v1916_v6  ;;  %v796_v1 = vsub.s32 1, %v791_v59 }
 0x199   : > { %1829 = vmatprep.subr.bf16.mxu1 %v1796_v36  ;;  %1919 = vrcp.f32 %v621_v5  ;;  %v694_v36 = vld [vmem:[%s2149_s28 + $0x38] sm:$0xff] }
 0x19a   : > { %1921 = vpow2.f32 %v1654_v62  ;;  %v2362_v5 = vrot.slane %v788_v63, %v796_v1 }
 0x19b   : > { %1923 = vrcp.f32 %v618_v9 }
 0x1a2   : > { %v1918_v10 = vpop.eup %1917 }
 0x1a3   : > { %v1920_v16 = vpop.eup %1919 }
 0x1ea   : > { %v720_v4 = vpop.permute.xlu1 %719 }
 0x1eb   : > { %v743_v7 = vmul.f32 %v2151_v54, %v720_v4  ;;  %v1922_v54 = vpop.eup %1921 }
 0x1ec   : > { %v622_v24 = vadd.f32 1.0, %v1922_v54  ;;  %v1924_v25 = vpop.eup %1923 }
 0x1ed   : > { %755 = vrot.lane.b32.xlu1 %v743_v7, %s2031_s11 }
 0x1ee   : > { %v666_v12 = vpop.permute.xlu1 %665 }
 0x1ef   : > { %v684_v13 = vmul.f32 %v1918_v10, %v666_v12 }
 0x1f1   : > { %v2290_v15 = vadd.f32 %v692_v11, %v684_v13 }
 0x1f2   : > { %v668_v17 = vpop.permute.xlu1 %667 }
 0x1f3   : > { %1925 = vtanh.f32 %v2290_v15  ;;  %v685_v18 = vmul.f32 %v1920_v16, %v668_v17 }
 0x1f5   : > { %v701_v23 = vadd.f32 %v693_v22, %v685_v18 }
 0x1f6   : > { %v724_v42 = vpop.permute.xlu1 %723 }
 0x1f7   : > { %1927 = vtanh.f32 %v701_v23  ;;  %v745_v44 = vmul.f32 %v2161_v0, %v724_v42 }
 0x1f8   : > { %1929 = vrcp.f32 %v622_v24 }
 0x1fb   : > { %v662_v28 = vpop.permute.xlu0 %661 }
 0x1fc   : > { %v682_v29 = vmul.f32 %v1924_v25, %v662_v28 }
 0x1fd   : > { %v1926_v30 = vpop.eup %1925 }
 0x1fe   : > { %v2295_v31 = vadd.f32 %v690_v27, %v682_v29  ;;  %729 = vrot.lane.b32.xlu1 %v1926_v30, %s2029_s29 }
 0x1ff   : > { %v722_v32 = vpop.permute.xlu0 %721 }
 0x200   : > { %1931 = vtanh.f32 %v2295_v31  ;;  %v744_v33 = vmul.f32 %v2179_v14, %v722_v32 }
 0x201   : > { %v1928_v20 = vpop.eup %1927 }
 0x202   : > { %757 = vrot.lane.b32.xlu0 %v744_v33, %s2031_s11  ;;  %v1930_v35 = vpop.eup %1929 }
 0x203   : > { %v728_v34 = vpop.permute.xlu0 %727 }
 0x204   : > { %v2311_v45 = vmul.f32 %v2187_v21, %v728_v34 }
 0x206   : > { %731 = vrot.lane.b32.xlu0 %v1928_v20, %s2029_s29 }
 0x207   : > { %v670_v37 = vpop.permute.xlu0 %669 }
 0x208   : > { %v686_v38 = vmul.f32 %v1930_v35, %v670_v37 }
 0x20a   : > { %v1932_v39 = vpop.eup %1931  ;;  %v702_v43 = vadd.f32 %v694_v36, %v686_v38 }
 0x20b   : > { %725 = vrot.lane.b32.xlu1 %v1932_v39, %s2029_s29 }
 0x20c   : > { %1933 = vtanh.f32 %v702_v43 }
 0x20f   : > { %759 = vrot.lane.b32.xlu1 %v745_v44, %s2031_s11 }
 0x216   : > { %v1934_v14 = vpop.eup %1933 }
 0x217   : > { %733 = vrot.lane.b32.xlu0 %v1934_v14, %s2029_s29 }
 0x21b   : > { %982 = vrot.lane.b32.xlu0 %v2192_v26, %s2029_s29 }
 0x21f   : > { %986 = vrot.lane.b32.xlu0 %v701_v23, %s2029_s29 }
 0x25f   : > { %v2313_v48 = vpop.permute.xlu1 %755 }
 0x260   : > { %v768_v0 = vsel %vm767_vm1, %v2313_v48, %v2311_v45 }
 0x261   : > { %1655 = vmatmul.mubr.msk.f32.vlgmr.msra.gmra.mrb[0].mxu1 %vm800_vm2, %v768_v0 }
 0x262   : > { %883 = vmatprep.mubr.f32.mxu1 %v2030_v2  ;;  %1831 = vmatpush1.bf16.msra.mxu1 %v2223_v40 }
 0x263   : > { %1833 = vmatprep.subr.bf16.mxu1 %v2225_v41 }
 0x266   : > { %1835 = vmatpush1.bf16.msra.mxu1 %v2240_v46 }
 0x267   : > { %1837 = vmatprep.subr.bf16.mxu1 %v2244_v47 }
 0x26a   : > { %1839 = vmatpush1.bf16.msra.mxu1 %v2260_v52 }
 0x26b   : > { %1841 = vmatprep.subr.bf16.mxu1 %v2264_v53 }
 0x26e   : > { %1843 = vmatpush1.bf16.msra.mxu1 %v2274_v57 }
 0x270   : > { %v730_v21 = vpop.permute.xlu1 %729 }
 0x271   : > { %v2327_v26 = vmul.f32 %v1918_v10, %v730_v21 }
 0x274   : > { %v2329_v49 = vpop.permute.xlu0 %757 }
 0x275   : > { %v769_v40 = vsel %vm767_vm1, %v2329_v49, %v2327_v26 }
 0x276   : > { %1656 = vmatmul.mubr.msk.f32.gmra.mrb[2].mxu1 %vm800_vm2, %v769_v40 }
 0x277   : > { %889 = vmatprep.mubr.f32.mxu1 %v2030_v2 }
 0x278   : > { %v732_v41 = vpop.permute.xlu0 %731 }
 0x279   : > { %v2336_v50 = vmul.f32 %v1920_v16, %v732_v41 }
 0x27d   : > { %v726_v46 = vpop.permute.xlu1 %725 }
 0x27e   : > { %v746_v47 = vmul.f32 %v1924_v25, %v726_v46 }
 0x280   : > { %761 = vrot.lane.b32.xlu1 %v746_v47, %s2031_s11 }
 0x281   : > { %v2339_v51 = vpop.permute.xlu1 %759 }
 0x282   : > { %v770_v52 = vsel %vm767_vm1, %v2339_v51, %v2336_v50 }
 0x283   : > { %1657 = vmatmul.mubr.msk.f32.gmra.mrb[4].mxu1 %vm800_vm2, %v770_v52 }
 0x284   : > { %984 = vrot.lane.b32.xlu1 %v2290_v15, %s2029_s29  ;;  %895 = vmatprep.mubr.f32.mxu1 %v2030_v2 }
 0x289   : > { %v734_v53 = vpop.permute.xlu0 %733 }
 0x28a   : > { %v2348_v55 = vmul.f32 %v1930_v35, %v734_v53 }
 0x28d   : > { %v983_v54 = vpop.permute.xlu0 %982 }
 0x291   : > { %v987_v42 = vpop.permute.xlu0 %986 }
 0x2f2   : > { %v2350_v56 = vpop.permute.xlu1 %761 }
 0x2f3   : > { %v771_v57 = vsel %vm767_vm1, %v2350_v56, %v2348_v55 }
 0x2f4   : > { %1658 = vmatmul.mubr.msk.f32.gmra.mrb[6].mxu1 %vm800_vm2, %v771_v57 }
 0x2f5   : > { %1283 = vmatprep.mubr.f32.mxu1 %v2030_v2 }
 0x2f6   : > { %v985_v35 = vpop.permute.xlu1 %984 }
 0x334   : > { %v879_v62 = vpop.f32.mrb[0].mxu1 }
 0x335   : > { %v880_v6 = vadd.f32 %v879_v62, %v2360_v3  ;;  %v881_v4 = vpop.f32.mrb[1].mxu1 }
 0x336   : > { %v882_v7 = vadd.f32 %v881_v4, %v2362_v5 }
 0x337   : > { %1935 = vtanh.f32 %v880_v6  ;;  %v1659_v44 = vmul.f32 -1.442695, %v880_v6 }
 0x338   : > { %v1663_v9 = vmul.f32 -1.442695, %v882_v7 }
 0x33a   : > { %1937 = vpow2.f32 %v1663_v9 }
 0x341   : > { %v1936_v10 = vpop.eup %1935 }
 0x342   : > { %958 = vrot.lane.b32.xlu1 %v1936_v10, %s2028_s25 }
 0x344   : > { %v1938_v11 = vpop.eup %1937 }
 0x345   : > { %v942_v12 = vadd.f32 1.0, %v1938_v11 }
 0x346   : > { %988 = vrot.lane.b32.xlu1 %v702_v43, %s2029_s29 }
 0x347   : > { %1939 = vrcp.f32 %v942_v12 }
 0x349   : > { %v885_v13 = vpop.f32.mrb[2].mxu1 }
 0x34a   : > { %v886_v15 = vadd.f32 %v885_v13, %v2360_v3  ;;  %v887_v16 = vpop.f32.mrb[3].mxu1 }
 0x34b   : > { %v888_v17 = vadd.f32 %v887_v16, %v2362_v5 }
 0x34c   : > { %1941 = vtanh.f32 %v886_v15  ;;  %v1660_v21 = vmul.f32 -1.442695, %v886_v15 }
 0x34d   : > { %v1664_v18 = vmul.f32 -1.442695, %v888_v17 }
 0x34f   : > { %1943 = vpow2.f32 %v1664_v18 }
 0x351   : > { %v1940_v22 = vpop.eup %1939 }
 0x352   : > { %v994_v23 = vmul.f32 %v1940_v22, %v983_v54  ;;  %v974_v41 = vmul.f32 %v1940_v22, %v2155_v60 }
 0x354   : > { %1002 = vrot.lane.b32.xlu0 %v994_v23, %s2031_s11 }
 0x356   : > { %v1942_v24 = vpop.eup %1941  ;;  %v891_v25 = vpop.f32.mrb[4].mxu1 }
 0x357   : > { %v892_v27 = vadd.f32 %v891_v25, %v2360_v3  ;;  %v893_v28 = vpop.f32.mrb[5].mxu1 }
 0x358   : > { %v894_v29 = vadd.f32 %v893_v28, %v2362_v5  ;;  %960 = vrot.lane.b32.xlu0 %v1942_v24, %s2028_s25 }
 0x359   : > { %v1944_v30 = vpop.eup %1943  ;;  %1945 = vtanh.f32 %v892_v27  ;;  %v1661_v62 = vmul.f32 -1.442695, %v892_v27 }
 0x35a   : > { %v943_v32 = vadd.f32 1.0, %v1944_v30  ;;  %v1665_v33 = vmul.f32 -1.442695, %v894_v29 }
 0x35c   : > { %1947 = vrcp.f32 %v943_v32 }
 0x35d   : > { %1949 = vpow2.f32 %v1665_v33 }
 0x363   : > { %v1946_v34 = vpop.eup %1945 }
 0x364   : > { %962 = vrot.lane.b32.xlu1 %v1946_v34, %s2028_s25 }
 0x366   : > { %v1948_v20 = vpop.eup %1947 }
 0x367   : > { %v995_v36 = vmul.f32 %v1948_v20, %v985_v35  ;;  %v1950_v37 = vpop.eup %1949  ;;  %v975_v13 = vmul.f32 %v1948_v20, %v2184_v19 }
 0x368   : > { %v944_v38 = vadd.f32 1.0, %v1950_v37 }
 0x369   : > { %1004 = vrot.lane.b32.xlu0 %v995_v36, %s2031_s11 }
 0x36a   : > { %1951 = vrcp.f32 %v944_v38 }
 0x36b   : > { %1953 = vpow2.f32 %v1659_v44 }
 0x374   : > { %v1952_v39 = vpop.eup %1951 }
 0x375   : > { %v996_v43 = vmul.f32 %v1952_v39, %v987_v42  ;;  %v1954_v14 = vpop.eup %1953  ;;  %v976_v29 = vmul.f32 %v1952_v39, %v2170_v8  ;;  %v2032_v39 = vmov 0.0|0.0  }
 0x376   : > { %v914_v0 = vadd.f32 1.0, %v1954_v14  ;;  %1844 = vmatprep.subr.bf16.mxu0 %v2032_v39  ;;  %1850 = vmatprep.subr.bf16.mxu1 %v2032_v39 }
 0x377   : > { %1006 = vrot.lane.b32.xlu1 %v996_v43, %s2031_s11 }
 0x378   : > { %1955 = vrcp.f32 %v914_v0 }
 0x379   : > { %1957 = vpow2.f32 %v1660_v21 }
 0x382   : > { %v1956_v46 = vpop.eup %1955 }
 0x383   : > { %v1958_v1 = vpop.eup %1957 }
 0x384   : > { %v915_v4 = vadd.f32 1.0, %v1958_v1  ;;  %v1329_v1 = vld [vmem:[%s2601_s7 + $0x18] sm:$0xff] }
 0x3b4   : > { %v959_v40 = vpop.permute.xlu1 %958 }
 0x3b5   : > { %v970_v52 = vmul.f32 %v1956_v46, %v959_v40 }
 0x3b8   : > { %v989_v23 = vpop.permute.xlu1 %988 }
 0x3c6   : > { %v1003_v47 = vpop.permute.xlu0 %1002 }
 0x3c7   : > { %v1014_v53 = vadd.f32 %v1003_v47, %v974_v41  ;;  %v897_v57 = vpop.f32.mrb[6].mxu1 }
 0x3c8   : > { %v898_v58 = vadd.f32 %v897_v57, %v2360_v3  ;;  %v899_v59 = vpop.f32.mrb[7].mxu1 }
 0x3c9   : > { %v2379_v61 = vadd.f32 %v1014_v53, %v970_v52  ;;  %v900_v63 = vadd.f32 %v899_v59, %v2362_v5  ;;  %v1327_v53 = vld [vmem:[%s2601_s7 + $0x8] sm:$0xff] }
 0x3ca   : > { %1959 = vtanh.f32 %v898_v58  ;;  %v961_v10 = vpop.permute.xlu0 %960  ;;  %v1662_v35 = vmul.f32 -1.442695, %v898_v58 }
 0x3cb   : > { %1961 = vtanh.f32 %v2379_v61  ;;  %v1666_v6 = vmul.f32 -1.442695, %v900_v63  ;;  %v1328_v63 = vld [vmem:[%s2601_s7 + $0x10] sm:$0xff] }
 0x3cd   : > { %1963 = vpow2.f32 %v1666_v6  ;;  %v2425_v6 = vpack.c.bf16 %v1329_v1, %v1328_v63 }
 0x3ce   : > { %1965 = vpow2.f32 %v1661_v62 }
 0x3cf   : > { %1967 = vrcp.f32 %v915_v4 }
 0x3d4   : > { %v1960_v60 = vpop.eup %1959 }
 0x3d5   : > { %v1962_v7 = vpop.eup %1961  ;;  %964 = vrot.lane.b32.xlu1 %v1960_v60, %s2028_s25 }
 0x3d6   : > { %1030 = vrot.lane.b32.xlu0 %v1962_v7, %s2029_s29  ;;  %v963_v27 = vpop.permute.xlu1 %962 }
 0x3d7   : > { %v1964_v9 = vpop.eup %1963 }
 0x3d8   : > { %v1966_v11 = vpop.eup %1965  ;;  %v945_v12 = vadd.f32 1.0, %v1964_v9 }
 0x3d9   : > { %v1968_v15 = vpop.eup %1967  ;;  %v916_v16 = vadd.f32 1.0, %v1966_v11 }
 0x3da   : > { %1969 = vrcp.f32 %v945_v12  ;;  %v971_v18 = vmul.f32 %v1968_v15, %v961_v10 }
 0x3db   : > { %v1005_v17 = vpop.permute.xlu0 %1004  ;;  %1971 = vrcp.f32 %v916_v16 }
 0x3dc   : > { %v1015_v22 = vadd.f32 %v1005_v17, %v975_v13 }
 0x3de   : > { %v2386_v54 = vadd.f32 %v1015_v22, %v971_v18 }
 0x3e0   : > { %1973 = vtanh.f32 %v2386_v54 }
 0x3e4   : > { %v1970_v24 = vpop.eup %1969 }
 0x3e5   : > { %v997_v25 = vmul.f32 %v1970_v24, %v989_v23  ;;  %v1972_v28 = vpop.eup %1971  ;;  %v977_v43 = vmul.f32 %v1970_v24, %v2295_v31  ;;  %v1326_v31 = vld [vmem:[%s2601_s7] sm:$0xff] }
 0x3e6   : > { %v972_v32 = vmul.f32 %v1972_v28, %v963_v27  ;;  %v2409_v58 = vpack.c.bf16 %v1327_v53, %v1326_v31 }
 0x3e7   : > { %1008 = vrot.lane.b32.xlu0 %v997_v25, %s2031_s11  ;;  %v2466_v25 = vld [vmem:[%s2602_s8] ss:$0 sm:$0xff] }
 0x3e9   : > { %v1007_v30 = vpop.permute.xlu1 %1006 }
 0x3ea   : > { %v1974_v19 = vpop.eup %1973  ;;  %v1016_v33 = vadd.f32 %v1007_v30, %v976_v29 }
 0x3eb   : > { %1032 = vrot.lane.b32.xlu1 %v1974_v19, %s2029_s29 }
 0x3ec   : > { %v1020_v34 = vadd.f32 %v1016_v33, %v972_v32 }
 0x3ee   : > { %1975 = vtanh.f32 %v1020_v34 }
 0x3ef   : > { %1977 = vpow2.f32 %v1662_v35 }
 0x3f8   : > { %v1976_v20 = vpop.eup %1975 }
 0x3f9   : > { %1034 = vrot.lane.b32.xlu0 %v1976_v20, %s2029_s29  ;;  %v1978_v36 = vpop.eup %1977 }
 0x3fa   : > { %v917_v42 = vadd.f32 1.0, %v1978_v36 }
 0x3fc   : > { %1979 = vrcp.f32 %v917_v42 }
 0x406   : > { %v1980_v44 = vpop.eup %1979 }
 0x447   : > { %v965_v8 = vpop.permute.xlu1 %964 }
 0x448   : > { %v1031_v37 = vpop.permute.xlu0 %1030  ;;  %v973_v0 = vmul.f32 %v1980_v44, %v965_v8 }
 0x449   : > { %v1042_v38 = vmul.f32 %v1956_v46, %v1031_v37 }
 0x44b   : > { %1048 = vrot.lane.b32.xlu1 %v1042_v38, %s2031_s11 }
 0x459   : > { %v1009_v14 = vpop.permute.xlu0 %1008 }
 0x45a   : > { %v1017_v21 = vadd.f32 %v1009_v14, %v977_v43 }
 0x45c   : > { %v1021_v40 = vadd.f32 %v1017_v21, %v973_v0 }
 0x45d   : > { %v1033_v41 = vpop.permute.xlu1 %1032 }
 0x45e   : > { %1981 = vtanh.f32 %v1021_v40  ;;  %v1043_v46 = vmul.f32 %v1968_v15, %v1033_v41 }
 0x460   : > { %1050 = vrot.lane.b32.xlu1 %v1043_v46, %s2031_s11 }
 0x464   : > { %1181 = vrot.lane.b32.xlu1 %v1021_v40, %s2029_s29 }
 0x468   : > { %v1982_v47 = vpop.eup %1981 }
 0x469   : > { %1036 = vrot.lane.b32.xlu0 %v1982_v47, %s2029_s29 }
 0x46b   : > { %v1035_v52 = vpop.permute.xlu0 %1034 }
 0x46c   : > { %v2407_v57 = vmul.f32 %v1972_v28, %v1035_v52 }
 0x46d   : > { %1179 = vrot.lane.b32.xlu0 %v1020_v34, %s2029_s29 }
 0x4bd   : > { %v2411_v59 = vpop.permute.xlu1 %1048 }
 0x4be   : > { %v1054_v62 = vsel %vm767_vm1, %v2411_v59, %v2407_v57 }
 0x4bf   : > { %1667 = vmatmul.mubr.msk.f32.vlgmr.msra.gmra.mrb[8].mxu0 %vm800_vm2, %v1054_v62 }
 0x4c0   : > { %1846 = vmatpush3.bf16.msra.mxu0 %v2409_v58  ;;  %1132 = vmatprep.mubr.f32.mxu0 %v2030_v2 }
 0x4c1   : > { %1847 = vmatprep.subr.bf16.mxu0 %v2032_v39 }
 0x4c4   : > { %1849 = vmatpush3.bf16.msra.mxu0 %v2425_v6 }
 0x4d2   : > { %v2431_v7 = vpop.permute.xlu1 %1050 }
 0x4d6   : > { %v1182_v14 = vpop.permute.xlu1 %1181 }
 0x4db   : > { %v1037_v4 = vpop.permute.xlu0 %1036 }
 0x4dc   : > { %v2429_v60 = vmul.f32 %v1980_v44, %v1037_v4 }
 0x4de   : > { %v1055_v9 = vsel %vm767_vm1, %v2431_v7, %v2429_v60 }
 0x4df   : > { %1668 = vmatmul.mubr.msk.f32.gmra.mrb[10].mxu0 %vm800_vm2, %v1055_v9  ;;  %v1180_v16 = vpop.permute.xlu0 %1179 }
 0x4e0   : > { %1747 = vmatprep.mubr.msk.f32.mxu0 %vm2033_vm3, %v2030_v2 }
 0x4e3   : > { %1748 = vmatmul.mubr.msk.f32.vlgmr.msra.gmra.mrb[12].mxu0 %vm767_vm1, %v2313_v48 }
 0x4e4   : > { %1750 = vmatprep.mubr.msk.f32.mxu0 %vm2033_vm3, %v2030_v2 }
 0x4e7   : > { %1751 = vmatmul.mubr.msk.f32.gmra.mrb[14].mxu0 %vm767_vm1, %v2329_v49 }
 0x4e8   : > { %1753 = vmatprep.mubr.msk.f32.mxu0 %vm2033_vm3, %v2030_v2 }
 0x4eb   : > { %1754 = vmatmul.mubr.msk.f32.gmra.mrb[16].mxu0 %vm767_vm1, %v2339_v51 }
 0x4ec   : > { %1756 = vmatprep.mubr.msk.f32.mxu0 %vm2033_vm3, %v2030_v2 }
 0x4ef   : > { %1757 = vmatmul.mubr.msk.f32.gmra.mrb[18].mxu0 %vm767_vm1, %v2350_v56 }
 0x4f0   : > { %1759 = vmatprep.mubr.msk.f32.mxu0 %vm2033_vm3, %v2030_v2 }
 0x592   : > { %v1128_v48 = vpop.f32.mrb[8].mxu0 }
 0x593   : > { %v1129_v10 = vadd.f32 %v1128_v48, %v2360_v3  ;;  %v1130_v49 = vpop.f32.mrb[9].mxu0 }
 0x594   : > { %v1131_v11 = vadd.f32 %v1130_v49, %v2362_v5 }
 0x595   : > { %1983 = vtanh.f32 %v1129_v10  ;;  %v1669_v21 = vmul.f32 -1.442695, %v1129_v10 }
 0x596   : > { %v1671_v12 = vmul.f32 -1.442695, %v1131_v11 }
 0x598   : > { %1985 = vpow2.f32 %v1671_v12 }
 0x59f   : > { %v1984_v51 = vpop.eup %1983 }
 0x5a0   : > { %1167 = vrot.lane.b32.xlu0 %v1984_v51, %s2028_s25 }
 0x5a2   : > { %v1986_v13 = vpop.eup %1985 }
 0x5a3   : > { %v1159_v15 = vadd.f32 1.0, %v1986_v13 }
 0x5a5   : > { %1987 = vrcp.f32 %v1159_v15 }
 0x5af   : > { %v1988_v56 = vpop.eup %1987 }
 0x5b0   : > { %v1185_v17 = vmul.f32 %v1988_v56, %v1180_v16  ;;  %v1175_v47 = vmul.f32 %v1988_v56, %v2379_v61 }
 0x5b2   : > { %v1134_v18 = vpop.f32.mrb[10].mxu0  ;;  %1189 = vrot.lane.b32.xlu1 %v1185_v17, %s2031_s11 }
 0x5b3   : > { %v1135_v22 = vadd.f32 %v1134_v18, %v2360_v3  ;;  %v1136_v23 = vpop.f32.mrb[11].mxu0 }
 0x5b4   : > { %v1137_v24 = vadd.f32 %v1136_v23, %v2362_v5 }
 0x5b5   : > { %1989 = vtanh.f32 %v1135_v22  ;;  %v1670_v31 = vmul.f32 -1.442695, %v1135_v22 }
 0x5b6   : > { %v1672_v27 = vmul.f32 -1.442695, %v1137_v24  ;;  %v1457_v28 = vpop.f32.mrb[12].mxu0 }
 0x5b7   : > { %v1458_v29 = vadd.f32 %v2466_v25, %v1457_v28  ;;  %v1749_v19 = vpop.f32.mrb[13].mxu0 }
 0x5b8   : > { %1991 = vpow2.f32 %v1672_v27 }
 0x5b9   : > { %1531 = vst.msk [vmem:[%s2471_s27] sm:$0xff] %vm767_vm1, %v1458_v29 }
 0x5ba   : > { %v1462_v30 = vpop.f32.mrb[14].mxu0 }
 0x5bb   : > { %v1463_v32 = vadd.f32 %v2466_v25, %v1462_v30  ;;  %v1752_v33 = vpop.f32.mrb[15].mxu0 }
 0x5bd   : > { %1532 = vst.msk [vmem:[%s2471_s27 + $0x8] sm:$0xff] %vm767_vm1, %v1463_v32 }
 0x5be   : > { %v1467_v34 = vpop.f32.mrb[16].mxu0 }
 0x5bf   : > { %v1990_v20 = vpop.eup %1989  ;;  %v1468_v35 = vadd.f32 %v2466_v25, %v1467_v34  ;;  %v1755_v36 = vpop.f32.mrb[17].mxu0 }
 0x5c0   : > { %1169 = vrot.lane.b32.xlu0 %v1990_v20, %s2028_s25 }
 0x5c1   : > { %1533 = vst.msk [vmem:[%s2471_s27 + $0x10] sm:$0xff] %vm767_vm1, %v1468_v35 }
 0x5c2   : > { %v1992_v37 = vpop.eup %1991  ;;  %v1472_v38 = vpop.f32.mrb[18].mxu0 }
 0x5c3   : > { %v1160_v42 = vadd.f32 1.0, %v1992_v37  ;;  %v1473_v8 = vadd.f32 %v2466_v25, %v1472_v38  ;;  %v1758_v43 = vpop.f32.mrb[19].mxu0 }
 0x5c5   : > { %1993 = vrcp.f32 %v1160_v42  ;;  %1534 = vst.msk [vmem:[%s2471_s27 + $0x18] sm:$0xff] %vm767_vm1, %v1473_v8 }
 0x5c6   : > { %1995 = vpow2.f32 %v1669_v21 }
 0x5cf   : > { %v1994_v44 = vpop.eup %1993 }
 0x5d0   : > { %v1186_v0 = vmul.f32 %v1994_v44, %v1182_v14  ;;  %v1996_v40 = vpop.eup %1995  ;;  %v1176_v49 = vmul.f32 %v1994_v44, %v2386_v54 }
 0x5d1   : > { %v1145_v41 = vadd.f32 1.0, %v1996_v40 }
 0x5d2   : > { %1191 = vrot.lane.b32.xlu1 %v1186_v0, %s2031_s11 }
 0x5d3   : > { %1997 = vrcp.f32 %v1145_v41 }
 0x5d4   : > { %1999 = vpow2.f32 %v1670_v31 }
 0x5dd   : > { %v1998_v52 = vpop.eup %1997 }
 0x5de   : > { %v2000_v4 = vpop.eup %1999 }
 0x5df   : > { %v1146_v48 = vadd.f32 1.0, %v2000_v4 }
 0x612   : > { %v1168_v46 = vpop.permute.xlu0 %1167 }
 0x613   : > { %v1173_v63 = vmul.f32 %v1998_v52, %v1168_v46 }
 0x624   : > { %v1190_v53 = vpop.permute.xlu1 %1189 }
 0x625   : > { %v1195_v1 = vadd.f32 %v1190_v53, %v1175_v47 }
 0x627   : > { %v2488_v62 = vadd.f32 %v1195_v1, %v1173_v63 }
 0x629   : > { %2001 = vtanh.f32 %v2488_v62 }
 0x62a   : > { %2003 = vrcp.f32 %v1146_v48 }
 0x632   : > { %v1170_v10 = vpop.permute.xlu0 %1169 }
 0x633   : > { %v2002_v9 = vpop.eup %2001 }
 0x634   : > { %1203 = vrot.lane.b32.xlu0 %v2002_v9, %s2029_s29  ;;  %v2004_v61 = vpop.eup %2003 }
 0x635   : > { %v1174_v12 = vmul.f32 %v2004_v61, %v1170_v10 }
 0x644   : > { %v1192_v11 = vpop.permute.xlu1 %1191 }
 0x645   : > { %v1196_v51 = vadd.f32 %v1192_v11, %v1176_v49 }
 0x647   : > { %v1198_v13 = vadd.f32 %v1196_v51, %v1174_v12 }
 0x649   : > { %2005 = vtanh.f32 %v1198_v13 }
 0x653   : > { %v2006_v15 = vpop.eup %2005 }
 0x654   : > { %1205 = vrot.lane.b32.xlu1 %v2006_v15, %s2029_s29 }
 0x658   : > { %1310 = vrot.lane.b32.xlu1 %v1198_v13, %s2029_s29 }
 0x6a6   : > { %v1204_v56 = vpop.permute.xlu0 %1203 }
 0x6a7   : > { %v1209_v16 = vmul.f32 %v1998_v52, %v1204_v56 }
 0x6a9   : > { %1212 = vrot.lane.b32.xlu0 %v1209_v16, %s2031_s11 }
 0x6c6   : > { %v1206_v17 = vpop.permute.xlu1 %1205 }
 0x6c7   : > { %v1210_v18 = vmul.f32 %v2004_v61, %v1206_v17 }
 0x71b   : > { %v2496_v22 = vpop.permute.xlu0 %1212 }
 0x71c   : > { %v1215_v54 = vsel %vm767_vm1, %v2496_v22, %v1210_v18 }
 0x71d   : > { %1673 = vmatmul.mubr.msk.f32.vlgmr.msra.gmra.mrb[8].mxu1 %vm800_vm2, %v1215_v54 }
 0x71e   : > { %1852 = vmatpush3.bf16.msra.mxu1 %v2409_v58  ;;  %1774 = vmatprep.mubr.msk.f32.mxu1 %vm2033_vm3, %v2030_v2 }
 0x71f   : > { %1851 = vmatprep.subr.bf16.mxu1 %v2032_v39 }
 0x722   : > { %1853 = vmatpush3.bf16.msra.mxu1 %v2425_v6 }
 0x725   : > { %1775 = vmatmul.mubr.msk.f32.vlgmr.msra.gmra.mrb[10].mxu1 %vm767_vm1, %v2431_v7 }
 0x726   : > { %1777 = vmatprep.mubr.msk.f32.mxu1 %vm2033_vm3, %v2030_v2 }
 0x7f0   : > { %v1285_v23 = vpop.f32.mrb[8].mxu1 }
 0x7f1   : > { %v1286_v24 = vadd.f32 %v1285_v23, %v2360_v3  ;;  %v1287_v27 = vpop.f32.mrb[9].mxu1  ;;  %v1311_v3 = vpop.permute.xlu1 %1310 }
 0x7f2   : > { %v1288_v58 = vadd.f32 %v1287_v27, %v2362_v5 }
 0x7f3   : > { %2007 = vtanh.f32 %v1286_v24  ;;  %v1674_v5 = vmul.f32 -1.442695, %v1286_v24 }
 0x7f4   : > { %v1675_v28 = vmul.f32 -1.442695, %v1288_v58 }
 0x7f6   : > { %2009 = vpow2.f32 %v1675_v28 }
 0x7f8   : > { %v1502_v29 = vpop.f32.mrb[10].mxu1 }
 0x7f9   : > { %v1503_v39 = vadd.f32 %v2466_v25, %v1502_v29  ;;  %v1776_v19 = vpop.f32.mrb[11].mxu1 }
 0x7fb   : > { %1540 = vst.msk [vmem:[%s2471_s27 + $0x48] sm:$0xff] %vm767_vm1, %v1503_v39 }
 0x7fd   : > { %v2008_v6 = vpop.eup %2007 }
 0x7fe   : > { %1304 = vrot.lane.b32.xlu0 %v2008_v6, %s2028_s25 }
 0x800   : > { %v2010_v7 = vpop.eup %2009 }
 0x801   : > { %v1300_v30 = vadd.f32 1.0, %v2010_v7 }
 0x803   : > { %2011 = vrcp.f32 %v1300_v30 }
 0x804   : > { %2013 = vpow2.f32 %v1674_v5 }
 0x80d   : > { %v2012_v32 = vpop.eup %2011 }
 0x80e   : > { %v1313_v33 = vmul.f32 %v2012_v32, %v1311_v3  ;;  %v2014_v34 = vpop.eup %2013  ;;  %v1308_v36 = vmul.f32 %v2012_v32, %v2488_v62 }
 0x80f   : > { %v1293_v20 = vadd.f32 1.0, %v2014_v34 }
 0x810   : > { %1315 = vrot.lane.b32.xlu1 %v1313_v33, %s2031_s11 }
 0x811   : > { %2015 = vrcp.f32 %v1293_v20 }
 0x814   : > { %1345 = vrot.lane.b32.xlu1 %v2311_v45, %s2031_s11 }
 0x818   : > { %1347 = vrot.lane.b32.xlu1 %v2327_v26, %s2031_s11 }
 0x81b   : > { %v2016_v37 = vpop.eup %2015 }
 0x81c   : > { %1349 = vrot.lane.b32.xlu1 %v2336_v50, %s2031_s11 }
 0x820   : > { %1357 = vrot.lane.b32.xlu1 %v1210_v18, %s2031_s11 }
 0x870   : > { %v1305_v35 = vpop.permute.xlu0 %1304 }
 0x871   : > { %v1307_v42 = vmul.f32 %v2016_v37, %v1305_v35 }
 0x882   : > { %v1316_v38 = vpop.permute.xlu1 %1315 }
 0x883   : > { %v1318_v45 = vadd.f32 %v1316_v38, %v1308_v36 }
 0x885   : > { %v1319_v8 = vadd.f32 %v1318_v45, %v1307_v42 }
 0x886   : > { %v1346_v43 = vpop.permute.xlu1 %1345 }
 0x887   : > { %2017 = vtanh.f32 %v1319_v8  ;;  %1760 = vmatmul.mubr.msk.f32.gmra.mrb[20].mxu0 %vm767_vm1, %v1346_v43 }
 0x888   : > { %1762 = vmatprep.mubr.msk.f32.mxu0 %vm2033_vm3, %v2030_v2 }
 0x88a   : > { %v1348_v26 = vpop.permute.xlu1 %1347 }
 0x88b   : > { %1763 = vmatmul.mubr.msk.f32.gmra.mrb[22].mxu0 %vm767_vm1, %v1348_v26 }
 0x88c   : > { %1765 = vmatprep.mubr.msk.f32.mxu0 %vm2033_vm3, %v2030_v2 }
 0x88e   : > { %v1350_v50 = vpop.permute.xlu1 %1349 }
 0x88f   : > { %1766 = vmatmul.mubr.msk.f32.gmra.mrb[24].mxu0 %vm767_vm1, %v1350_v50 }
 0x890   : > { %1768 = vmatprep.mubr.msk.f32.mxu0 %vm2033_vm3, %v2030_v2 }
 0x891   : > { %v2018_v44 = vpop.eup %2017 }
 0x892   : > { %1322 = vrot.lane.b32.xlu0 %v2018_v44, %s2029_s29 }
 0x896   : > { %1353 = vrot.lane.b32.xlu0 %v2407_v57, %s2031_s11 }
 0x89a   : > { %1355 = vrot.lane.b32.xlu0 %v2429_v60, %s2031_s11 }
 0x89e   : > { %1351 = vrot.lane.b32.xlu0 %v2348_v55, %s2031_s11  ;;  %v1358_v55 = vpop.permute.xlu1 %1357 }
 0x904   : > { %v1323_v14 = vpop.permute.xlu0 %1322 }
 0x905   : > { %v1325_v0 = vmul.f32 %v2016_v37, %v1323_v14 }
 0x907   : > { %1359 = vrot.lane.b32.xlu0 %v1325_v0, %s2031_s11 }
 0x908   : > { %v1354_v21 = vpop.permute.xlu0 %1353 }
 0x909   : > { %1778 = vmatmul.mubr.msk.f32.gmra.mrb[12].mxu1 %vm767_vm1, %v1354_v21 }
 0x90a   : > { %1780 = vmatprep.mubr.msk.f32.mxu1 %vm2033_vm3, %v2030_v2 }
 0x90c   : > { %v1356_v40 = vpop.permute.xlu0 %1355 }
 0x90d   : > { %1781 = vmatmul.mubr.msk.f32.gmra.mrb[14].mxu1 %vm767_vm1, %v1356_v40 }
 0x90e   : > { %1783 = vmatprep.mubr.msk.f32.mxu1 %vm2033_vm3, %v2030_v2 }
 0x910   : > { %v1352_v57 = vpop.permute.xlu0 %1351 }
 0x911   : > { %1769 = vmatmul.mubr.msk.f32.gmra.mrb[26].mxu0 %vm767_vm1, %v1352_v57  ;;  %1784 = vmatmul.mubr.msk.f32.gmra.mrb[16].mxu1 %vm767_vm1, %v2496_v22 }
 0x912   : > { %1771 = vmatprep.mubr.msk.f32.mxu0 %vm2033_vm3, %v2030_v2  ;;  %1786 = vmatprep.mubr.msk.f32.mxu1 %vm2033_vm3, %v2030_v2 }
 0x915   : > { %1772 = vmatmul.mubr.msk.f32.gmra.mrb[28].mxu0 %vm767_vm1, %v2411_v59  ;;  %1787 = vmatmul.mubr.msk.f32.gmra.mrb[18].mxu1 %vm767_vm1, %v1358_v55 }
 0x916   : > { %1789 = vmatprep.mubr.msk.f32.mxu1 %vm2033_vm3, %v2030_v2 }
 0x95a   : > { %v1477_v60 = vpop.f32.mrb[20].mxu0 }
 0x95b   : > { %v1478_v41 = vadd.f32 %v2466_v25, %v1477_v60  ;;  %v1761_v46 = vpop.f32.mrb[21].mxu0 }
 0x95d   : > { %1535 = vst.msk [vmem:[%s2471_s27 + $0x20] sm:$0xff] %vm767_vm1, %v1478_v41 }
 0x95e   : > { %v1482_v47 = vpop.f32.mrb[22].mxu0 }
 0x95f   : > { %v1483_v52 = vadd.f32 %v2466_v25, %v1482_v47  ;;  %v1764_v31 = vpop.f32.mrb[23].mxu0 }
 0x961   : > { %1536 = vst.msk [vmem:[%s2471_s27 + $0x28] sm:$0xff] %vm767_vm1, %v1483_v52 }
 0x962   : > { %v1487_v59 = vpop.f32.mrb[24].mxu0 }
 0x963   : > { %v1488_v53 = vadd.f32 %v2466_v25, %v1487_v59  ;;  %v1767_v63 = vpop.f32.mrb[25].mxu0 }
 0x965   : > { %1537 = vst.msk [vmem:[%s2471_s27 + $0x30] sm:$0xff] %vm767_vm1, %v1488_v53 }
 0x979   : > { %v1360_v2 = vpop.permute.xlu0 %1359 }
 0x97a   : > { %1790 = vmatmul.mubr.msk.f32.gmra.mrb[20].mxu1 %vm767_vm1, %v1360_v2 }
 0x9dc   : > { %v1507_v1 = vpop.f32.mrb[12].mxu1 }
 0x9dd   : > { %v1508_v62 = vadd.f32 %v2466_v25, %v1507_v1  ;;  %v1779_v4 = vpop.f32.mrb[13].mxu1 }
 0x9df   : > { %1541 = vst.msk [vmem:[%s2471_s27 + $0x50] sm:$0xff] %vm767_vm1, %v1508_v62 }
 0x9e0   : > { %v1512_v9 = vpop.f32.mrb[14].mxu1 }
 0x9e1   : > { %v1513_v48 = vadd.f32 %v2466_v25, %v1512_v9  ;;  %v1782_v10 = vpop.f32.mrb[15].mxu1 }
 0x9e3   : > { %1542 = vst.msk [vmem:[%s2471_s27 + $0x58] sm:$0xff] %vm767_vm1, %v1513_v48 }
 0x9e4   : > { %v1492_v49 = vpop.f32.mrb[26].mxu0  ;;  %v1517_v61 = vpop.f32.mrb[16].mxu1 }
 0x9e5   : > { %v1493_v11 = vadd.f32 %v2466_v25, %v1492_v49  ;;  %v1518_v12 = vadd.f32 %v2466_v25, %v1517_v61  ;;  %v1770_v51 = vpop.f32.mrb[27].mxu0  ;;  %v1785_v13 = vpop.f32.mrb[17].mxu1 }
 0x9e7   : > { %1538 = vst.msk [vmem:[%s2471_s27 + $0x38] sm:$0xff] %vm767_vm1, %v1493_v11  ;;  %1543 = vst.msk [vmem:[%s2471_s27 + $0x60] sm:$0xff] %vm767_vm1, %v1518_v12 }
 0x9e8   : > { %v1497_v15 = vpop.f32.mrb[28].mxu0  ;;  %v1522_v56 = vpop.f32.mrb[18].mxu1 }
 0x9e9   : > { %v1498_v16 = vadd.f32 %v2466_v25, %v1497_v15  ;;  %v1523_v17 = vadd.f32 %v2466_v25, %v1522_v56  ;;  %v1773_v18 = vpop.f32.mrb[29].mxu0  ;;  %v1788_v22 = vpop.f32.mrb[19].mxu1 }
 0x9eb   : > { %1539 = vst.msk [vmem:[%s2471_s27 + $0x40] sm:$0xff] %vm767_vm1, %v1498_v16  ;;  %1544 = vst.msk [vmem:[%s2471_s27 + $0x68] sm:$0xff] %vm767_vm1, %v1523_v17 }
 0xa4d   : > { %v1527_v54 = vpop.f32.mrb[20].mxu1 }
 0xa4e   : > { %v1528_v23 = vadd.f32 %v2466_v25, %v1527_v54  ;;  %v1791_v24 = vpop.f32.mrb[21].mxu1 }
 0xa50   : > { %1545 = vst.msk [vmem:[%s2471_s27 + $0x70] sm:$0xff] %vm767_vm1, %v1528_v23 }
 0xa51 PF: > { %s19_s30 = sadd.s32 1, %s2025_s30  }
 0xa52   : > { %p16_p5 = scmp.ge.s32.totalorder %s19_s30, 4  }
 0xa54   :  { %18 = sbr.rel (!%p16_p5) target bundleno = 1 (0x1), region = 92 }

</bundles_post_ra>
